<compile_context>
chip_gen: v5e
topology: v5e:2x2
jax: 0.10.0
libtpu: 0.0.40
codegen_flags: <defaults>
</compile_context>

<pallas_src>
import functools

import jax
import jax.numpy as jnp
from jax.experimental import pallas as pl
from jax.experimental.pallas import tpu as pltpu


def _atten_linear_kernel(compute_dtype, x_ref, w_ref, o_ref):
    Bt, N, D = x_ref.shape
    x3 = x_ref[...]
    # Flatten (Bt, N, D) -> (Bt*N, D); layout-preserving (no tile crossing).
    x2 = x3.reshape(Bt * N, D).astype(compute_dtype)

    # Single fused, lane-dense projection:
    #   columns [0:D)  = x @ (Wq.T @ Wk * scale)   (key proj folded into query)
    #   columns [D:2D) = x @ (Wv.T @ Wout.T)       (output proj folded into V)
    qv = jnp.dot(x2, w_ref[...], preferred_element_type=jnp.float32)
    q_fused = qv[:, :D].reshape(Bt, N, D)
    v_fused = qv[:, D:].reshape(Bt, N, D)

    # sim[b,i,j] = sum_d q_fused[b,i,d] * x[b,j,d]   ('NT' contraction, no .T)
    sim = jnp.einsum('bid,bjd->bij',
                     q_fused.astype(compute_dtype), x3.astype(compute_dtype),
                     preferred_element_type=jnp.float32)

    # Numerically-stable softmax over j in f32; divide is an approximate
    # reciprocal on the otherwise-idle EUP slot.
    sim_max = jnp.max(sim, axis=-1, keepdims=True)
    p = jnp.exp(sim - sim_max)
    attn = p * pl.reciprocal(jnp.sum(p, axis=-1, keepdims=True), approx=True)

    # out[b,i,d] = sum_j attn[b,i,j] * v_fused[b,j,d]   (Wout already applied)
    out = jnp.einsum('bij,bjd->bid',
                     attn.astype(compute_dtype), v_fused.astype(compute_dtype),
                     preferred_element_type=jnp.float32)
    o_ref[...] = out.astype(o_ref.dtype)


def _tpu_config():
    """Returns (tensorcores_per_chip, per-step VMEM working budget, vmem_limit_bytes)."""
    kind = ""
    try:
        kind = jax.devices()[0].device_kind.lower()
    except Exception:
        pass
    if "v7" in kind or "7x" in kind:
        cores, budget, limit = 2, 20 << 20, 40 << 20   # v7x: 2 TCs, 64 MiB physical VMEM
    elif "v6" in kind:
        cores, budget, limit = 1, 48 << 20, 64 << 20   # v6e: 1 TC, 128 MiB physical
    elif "v5e" in kind or "v5 lite" in kind or "v5lite" in kind:
        cores, budget, limit = 1, 48 << 20, 64 << 20   # v5e: 1 TC, 128 MiB physical
    elif "v5" in kind or "v4" in kind:
        cores, budget, limit = 2, 48 << 20, 64 << 20   # v5p / v4 megacore
    else:
        cores, budget, limit = 2, 20 << 20, 32 << 20   # unknown: conservative
    try:  # refine with physical VMEM size when the trace-time query is available
        phys = getattr(pltpu.get_tpu_info(), "vmem_capacity_bytes", None)
        if phys:
            limit = min(limit, int(phys) // 2)
            budget = min(budget, max(limit - (8 << 20), 4 << 20))
    except Exception:
        pass
    return cores, budget, limit


def _default_batch_tile(B, N, D, x_itemsize, compute_itemsize, cores, budget):
    """Largest divisor of B whose per-step working set fits in `budget`,
    keeping the grid-step count a multiple of the TensorCore count."""
    f32 = 4
    # Tightened per-batch-element estimate (bytes): double-buffered x block +
    # compute-dtype copy, fused-projection result + q/v compute-dtype copies,
    # sim + exp temp + attn copy, f32 pre-store output + double-buffered out block.
    per_b = (2 * N * D * x_itemsize + N * D * compute_itemsize
             + N * (2 * D) * f32 + 2 * N * D * compute_itemsize
             + 2 * N * N * f32 + N * N * compute_itemsize
             + N * D * f32 + 2 * N * D * x_itemsize)
    fixed = 2 * D * (2 * D) * compute_itemsize        # double-buffered fused weight
    cap = max(1, (budget - fixed) // max(per_b, 1))
    divisors = [d for d in range(B, 0, -1) if B % d == 0]
    bt = next(d for d in divisors if d <= cap)        # d == 1 always qualifies
    if cores > 1:
        # Shard the batch grid evenly across TensorCores: prefer a step count
        # that is a multiple of `cores` (an odd split leaves one core idle).
        for d in divisors:
            if d <= bt and (B // d) % cores == 0:
                return d
        if bt == B and B > 1:                         # at least give both cores work
            return divisors[1]
    return bt


def atten_linear(x, wq, wkv, wout, *, batch_tile=None, mxu_dtype=None):
    B, N, D = x.shape
    assert wq.shape == (D, D) and wkv.shape == (2 * D, D) and wout.shape == (D, D)
    scale = float(D) ** -0.5
    compute_dtype = jnp.dtype(mxu_dtype) if mxu_dtype is not None else jnp.dtype(x.dtype)

    # ---- one-time weight prep, hoisted out of the grid (plain XLA ops) ----
    wk = wkv[:D]                                # k = x @ wk.T
    wv = wkv[D:]                                # v = x @ wv.T
    # Exact fusions (linear ops commute; no bias / nonlinearity in between):
    #   sim = (x Wq^T)(x Wk^T)^T * s = x (Wq^T Wk s) x^T
    #   out = attn (x Wv^T) Wout^T   = attn (x (Wv^T Wout^T))
    wqk = (wq.T @ wk) * scale                                   # (D, D)
    wvo = wv.T @ wout.T                                         # (D, D)
    w_fused = jnp.concatenate([wqk, wvo], axis=1).astype(compute_dtype)  # (D, 2D)

    cores, budget, vmem_limit = _tpu_config()
    if batch_tile is None:
        batch_tile = _default_batch_tile(
            B, N, D, jnp.dtype(x.dtype).itemsize, compute_dtype.itemsize,
            cores, budget)
    assert B % batch_tile == 0, "batch_tile must divide batch"
    Bt = batch_tile

    flops = 4 * B * N * D * D + 4 * B * N * N * D       # fused proj + 2 attention matmuls
    bytes_accessed = (x.size * x.dtype.itemsize
                      + w_fused.size * w_fused.dtype.itemsize
                      + B * N * D * x.dtype.itemsize)

    kernel = functools.partial(_atten_linear_kernel, compute_dtype)

    # TODO(synk): for large N, tile the key axis with an online (flash-style)
    # softmax instead of materializing the (Bt, N, N) sim block, and mark the
    # resident weight spec pipeline_mode=pl.Buffered(1) for very large D.
    return pl.pallas_call(
        kernel,
        out_shape=jax.ShapeDtypeStruct((B, N, D), x.dtype),
        grid_spec=pltpu.PrefetchScalarGridSpec(
            num_scalar_prefetch=0,
            grid=(B // Bt,),
            in_specs=[
                pl.BlockSpec((Bt, N, D), lambda b: (b, 0, 0)),   # x, Bt batches/step
                pl.BlockSpec((D, 2 * D), lambda b: (0, 0)),      # fused weights (resident)
            ],
            out_specs=pl.BlockSpec((Bt, N, D), lambda b: (b, 0, 0)),
        ),
        compiler_params=pltpu.CompilerParams(
            dimension_semantics=("parallel",),
            vmem_limit_bytes=vmem_limit),
        cost_estimate=pl.CostEstimate(
            flops=flops, transcendentals=B * N * N,
            bytes_accessed=bytes_accessed),
    )(x, w_fused)


def atten_linear_ref(x, wq, wkv, wout):
    """Pure-JAX reference of the exact PyTorch forward (context=None)."""
    D = wq.shape[0]
    scale = float(D) ** -0.5
    q = jnp.einsum('bnd,od->bno', x, wq)          # to_q (no bias)
    kv = jnp.einsum('bnd,od->bno', x, wkv)        # to_kv (no bias)
    k, v = kv[..., :D], kv[..., D:]
    sim = jnp.einsum('bid,bjd->bij', q, k) * scale
    attn = jax.nn.softmax(sim, axis=-1)
    out = jnp.einsum('bij,bjd->bid', attn, v)
    return jnp.einsum('bid,od->bio', out, wout)   # to_out (no bias)


if __name__ == "__main__":
    key = jax.random.PRNGKey(0)
    B, N, D = 8, 64, 128   # batch, seq, query_dim (D=128 keeps stores lane-dense)
    kx, kq, kkv, ko = jax.random.split(key, 4)

    x = jax.random.normal(kx, (B, N, D), dtype=jnp.float32)

    # PyTorch nn.Linear default init: U(-1/sqrt(fan_in), 1/sqrt(fan_in)), no bias.
    bound = 1.0 / (D ** 0.5)
    wq = jax.random.uniform(kq, (D, D), jnp.float32, -bound, bound)
    wkv = jax.random.uniform(kkv, (2 * D, D), jnp.float32, -bound, bound)
    wout = jax.random.uniform(ko, (D, D), jnp.float32, -bound, bound)

    out = jax.block_until_ready(atten_linear(x, wq, wkv, wout))
    ref = atten_linear_ref(x, wq, wkv, wout)
    assert out.shape == (B, N, D)
    assert jnp.allclose(out, ref, atol=1e-2, rtol=1e-2), (
        float(jnp.max(jnp.abs(out - ref))))
    print("KERNEL_OK")
</pallas_src>

<mosaic_0001>
module attributes {stable_mosaic.version = 11 : i64} {
  func.func @_atten_linear_kernel(%arg0: i32, %arg1: memref<4x64x128xf32, #tpu.memory_space<vmem>>, %arg2: memref<128x256xf32, #tpu.memory_space<vmem>>, %arg3: memref<4x64x128xf32, #tpu.memory_space<vmem>>) attributes {dimension_semantics = [#tpu.dimension_semantics<parallel>], iteration_bounds = array<i64: 2>, scalar_prefetch = 0 : i64, scratch_operands = 0 : i64, tpu.core_type = #tpu.core_type<tc>, window_params = [{transform_indices = @transform_0, window_bounds = array<i64: 4, 64, 128>}, {pipeline_mode = #tpu.pipeline_mode<synchronous>, transform_indices = @transform_1, window_bounds = array<i64: 128, 256>}, {transform_indices = @transform_2, window_bounds = array<i64: 4, 64, 128>}]} {
    %c0 = arith.constant 0 : index
    %c0_0 = arith.constant 0 : index
    %c0_1 = arith.constant 0 : index
    %0 = vector.load %arg1[%c0, %c0_0, %c0_1] : memref<4x64x128xf32, #tpu.memory_space<vmem>>, vector<4x64x128xf32>
    %1 = vector.shape_cast %0 : vector<4x64x128xf32> to vector<256x128xf32>
    %c0_2 = arith.constant 0 : index
    %c0_3 = arith.constant 0 : index
    %2 = vector.load %arg2[%c0_2, %c0_3] : memref<128x256xf32, #tpu.memory_space<vmem>>, vector<128x256xf32>
    %cst = arith.constant dense<0.000000e+00> : vector<256x256xf32>
    %3 = tpu.matmul %1, %2, %cst {dimension_numbers = #tpu.dot_dimension_numbers<[1], [0], [0], [1], [0, 0, 1, 1], [], []>} : vector<256x128xf32>, vector<128x256xf32>, vector<256x256xf32> -> vector<256x256xf32>
    %4 = vector.extract_strided_slice %3 {offsets = [0, 0], sizes = [256, 128], strides = [1, 1]} : vector<256x256xf32> to vector<256x128xf32>
    %5 = vector.shape_cast %4 : vector<256x128xf32> to vector<4x64x128xf32>
    %6 = vector.extract_strided_slice %3 {offsets = [0, 128], sizes = [256, 128], strides = [1, 1]} : vector<256x256xf32> to vector<256x128xf32>
    %7 = vector.shape_cast %6 : vector<256x128xf32> to vector<4x64x128xf32>
    "tpu.trace_start"() <{level = 10 : i32, message = "bid,bjd->bij"}> : () -> ()
    %cst_4 = arith.constant dense<0.000000e+00> : vector<4x64x64xf32>
    %8 = tpu.matmul %5, %0, %cst_4 {dimension_numbers = #tpu.dot_dimension_numbers<[2], [2], [1], [1], [0, 0, 0, 1, 1, 1], [0], [0]>} : vector<4x64x128xf32>, vector<4x64x128xf32>, vector<4x64x64xf32> -> vector<4x64x64xf32>
    "tpu.trace_stop"() : () -> ()
    %cst_5 = arith.constant dense<0xFF800000> : vector<4x64xf32>
    %9 = vector.multi_reduction <maximumf>, %8, %cst_5 [2] : vector<4x64x64xf32> to vector<4x64xf32>
    %10 = vector.shape_cast %9 : vector<4x64xf32> to vector<4x64x1xf32>
    %11 = vector.broadcast %10 : vector<4x64x1xf32> to vector<4x64x64xf32>
    %12 = arith.subf %8, %11 : vector<4x64x64xf32>
    %13 = math.exp %12 : vector<4x64x64xf32>
    %cst_6 = arith.constant dense<0.000000e+00> : vector<4x64xf32>
    %14 = vector.multi_reduction <add>, %13, %cst_6 [2] : vector<4x64x64xf32> to vector<4x64xf32>
    %15 = vector.shape_cast %14 : vector<4x64xf32> to vector<4x64x1xf32>
    %16 = tpu.reciprocal %15 {approx = true} : vector<4x64x1xf32> -> vector<4x64x1xf32>
    %17 = vector.broadcast %16 : vector<4x64x1xf32> to vector<4x64x64xf32>
    %18 = arith.mulf %13, %17 : vector<4x64x64xf32>
    "tpu.trace_start"() <{level = 10 : i32, message = "bij,bjd->bid"}> : () -> ()
    %cst_7 = arith.constant dense<0.000000e+00> : vector<4x64x128xf32>
    %19 = tpu.matmul %18, %7, %cst_7 {dimension_numbers = #tpu.dot_dimension_numbers<[2], [1], [1], [2], [0, 0, 0, 1, 1, 2], [0], [0]>} : vector<4x64x64xf32>, vector<4x64x128xf32>, vector<4x64x128xf32> -> vector<4x64x128xf32>
    "tpu.trace_stop"() : () -> ()
    %c0_8 = arith.constant 0 : index
    %c0_9 = arith.constant 0 : index
    %c0_10 = arith.constant 0 : index
    %20 = vector.load %arg3[%c0_8, %c0_9, %c0_10] : memref<4x64x128xf32, #tpu.memory_space<vmem>>, vector<4x64x128xf32>
    tpu.vector_store %arg3[%c0_8, %c0_9, %c0_10], %19 {strides = array<i32>} : memref<4x64x128xf32, #tpu.memory_space<vmem>>, vector<4x64x128xf32>,
    return
  }
  func.func @transform_0(%arg0: i32) -> (i32, i32, i32) {
    %c0_i32 = arith.constant 0 : i32
    %c0_i32_0 = arith.constant 0 : i32
    %c0_i32_1 = arith.constant 0 : i32
    return %arg0, %c0_i32, %c0_i32_0 : i32, i32, i32
  }
  func.func @transform_1(%arg0: i32) -> (i32, i32) {
    %c0_i32 = arith.constant 0 : i32
    %c0_i32_0 = arith.constant 0 : i32
    %c0_i32_1 = arith.constant 0 : i32
    return %c0_i32, %c0_i32_0 : i32, i32
  }
  func.func @transform_2(%arg0: i32) -> (i32, i32, i32) {
    %c0_i32 = arith.constant 0 : i32
    %c0_i32_0 = arith.constant 0 : i32
    %c0_i32_1 = arith.constant 0 : i32
    return %arg0, %c0_i32, %c0_i32_0 : i32, i32, i32
  }
}

</mosaic_0001>

<bundles_post_ra>
// kernel: tpu_custom_call.1
= control target key start
LH: loop header
LB: loop body
LE: loop exit
PB: predicated region body
PF: predicated region fallthrough
CT: control target
= control target key end

     0   :  { %7 = vsyncpa [#allocation3], 0  ;;  %s2531_s0 = inlined_call_operand.hbm [shape: f32[8,64,128], index: 0, kind: input, shape index: {}]   ;;  %s2532_s1 = inlined_call_operand.hbm [shape: f32[128,256], index: 1, kind: input, shape index: {}]   ;;  %s2533_s2 = inlined_call_operand.hbm [shape: f32[8,64,128], index: 2, kind: output, shape index: {}]  }
   0x1   :  { %9 = vsyncpa [#allocation3 + $0x1], 0 }
   0x2   :  { %10 = vsyncpa [#allocation6], 0 }
   0x3   :  { %11 = vsyncpa [#allocation4], 0 }
   0x4   :  { %13 = vsyncpa [#allocation4 + $0x1], 0  ;;  %s1782_s9 = smov 0   ;;  %s1784_s10 = smov 0  }
   0x5   :  { %s1786_s11 = smov 0   ;;  %s1788_s12 = smov 0  }
   0x6 LB: > { %s1803_s13 = sadd.s32 4294967295, %s1758_s12   ;;  %s1383_s14 = sadd.s32 4294967294, %s1758_s12   ;;  %s1758_s12 = sphi %s1788_s12, %s2543_s12   ;;  %s1754_s11 = sphi %s1786_s11, %s2542_s11   ;;  %s1750_s10 = sphi %s1784_s10, %s2541_s10   ;;  %s1746_s9 = sphi %s1782_s9, %s2540_s9  }
   0x7   : > { %p39_p0 = scmp.ne.s32.totalorder %s1750_s10, %s1746_s9  ;;  %p40_p1 = scmp.eq.s32.totalorder %s1803_s13, 0 }
   0x8   : > { %p84_p2 = scmp.eq.s32.totalorder %s1803_s13, 1  ;;  %p90_p3 = scmp.eq.s32.totalorder %s1383_s14, 1 }
   0x9   : > { %p1812_p4 = por %p40_p1, %p39_p0  ;;  %p1384_p5 = scmp.ge.s32.totalorder %s1758_s12, 1 }
   0xa   : > { %p1817_p6 = por %p90_p3, %p39_p0  ;;  %p97_p7 = scmp.lt.s32.totalorder %s1758_s12, 3 }
   0xb   : > { %s108_s19 = sshll.u32 %s2532_s1, 4  ;;  %s1760_s21 = smov [#allocation5]   ;;  %s109_s19 = int_to_ptr.hbm [resolvable:$true] %s108_s19 }
   0xc   : > { %p1825_p8 = pnand %p1384_p5, %p97_p7  ;;  %s110_s22 = sshll.u32 %s1760_s21, 4  ;;  %s111_s22 = int_to_ptr.vmem [resolvable:$true] %s110_s22 }
   0xd   : > { %s1835_s23 = sadd.s32 1, %s1758_s12   ;;  %s1761_s24 = smov 256  }
   0xe   : > { %p1445_p9 = pneg %p1825_p8  ;;  %s1762_s25 = smov 16  }
   0xf   : > { %s23_s26 = ssub.s32 %s1758_s12, %s1835_s23  ;;  %s26_s27 = sadd.s32 1, %s1754_s11 }
  0x10   : > { %p1446_p10 = pnand %p1445_p9, %p40_p1  ;;  %p24_p12 = scmp.eq.s32.totalorder %s23_s26, 0 }
  0x11   : > { %p33_p13 = scmp.ne.s32.totalorder %s1754_s11, %s1750_s10  ;;  %p34_p0 = scmp.eq.s32.totalorder %s1758_s12, 0 }
  0x12   : > { %1448 = dma.hbm_to_vmem [thread:$0]  (!%p1446_p10), %s109_s19, 4096, %s111_s22, [#allocation6], %s1761_s24, %s1761_s24, %s1762_s25  }
  0x13   : > { %p1458_p3 = scmp.lt.s32.totalorder %s1758_s12, 2  ;;  %p35_p5 = por %p34_p0, %p33_p13 }
  0x14   : > { %s1845_s28 = scalar_select %p24_p12, %s1754_s11, %s26_s27  }
  0x15   : > { %p1849_p7 = por %p84_p2, %p33_p13  ;;  %s124_s30 = sand.u32 1, %s1754_s11  }
  0x16   : > { %s1434_s3 = sshll.u32 %s1758_s12, 8  ;;  %s1387_s4 = sshll.u32 %s124_s30, 8 }
  0x17   : > { %s134_s7 = scalar_lea.hbm %s2531_s0, %s1434_s3  ;;  %s128_s14 = scalar_lea.vmem [#allocation2], %s1387_s4 }
  0x18   : > { %s135_s8 = sshll.u32 %s134_s7, 4  ;;  %s137_s17 = sshll.u32 %s128_s14, 4  ;;  %s136_s8 = int_to_ptr.hbm [resolvable:$true] %s135_s8  ;;  %s138_s17 = int_to_ptr.vmem [resolvable:$true] %s137_s17 }
  0x19   : > { %p1860_p9 = pnand %p1458_p3, %p35_p5  ;;  %s125_s19 = scalar_lea.sflag [#allocation3], %s124_s30 }
  0x1a   : > { %s1658_s21 = sshra.s32 %s136_s8, 4  ;;  %s1665_s26 = scalar_lea.hbm %s2531_s0, 512  ;;  %s1659_s21 = int_to_ptr.hbm [resolvable:$true] %s1658_s21 }
  0x1b   : > { %s1660_s22 = scalar_lea.hbm %s1659_s21, 256  ;;  %p1662_p10 = pneg %p1860_p9 }
  0x1c   : > { %p1661_p2 = scmp.ne.s32.totalorder %s1659_s21, %s1660_s22  ;;  %p1666_p0 = scmp.lt.s32.totalorder %s1659_s21, %s2531_s0 }
  0x1d   : > { %p1667_p3 = scmp.lt.s32.totalorder %s1665_s26, %s1660_s22 }
  0x1e   : > { %p1663_p12 = pnand %p1662_p10, %p1661_p2 }
  0x1f   : > { %p1668_p5 = por %p1667_p3, %p1666_p0 }
  0x20   : > { %p1664_p13 = pneg %p1663_p12 }
  0x22   : > { %p1669_p11 = pnand %p1668_p5, %p1664_p13 }
  0x24   : > { %1672 = shalt.err (!%p1669_p11)
}
  0x25   : > { %s1763_s30 = smov 128   ;;  %s1764_s4 = smov 8  }
  0x26   : > { %1452 = dma.hbm_to_vmem [thread:$0]  (!%p1860_p9), %s136_s8, 4096, %s138_s17, %s125_s19, %s1763_s30, %s1763_s30, %s1764_s4  }
  0x27   : > { %149 = sbr.rel (%p1825_p8) target bundleno = 999 (0x3e7), region = 28  ;;  %s1877_s5 = sand.u32 (!%p1825_p8), 1, %s1750_s10  }
  0x28   : > { %s1392_s6 = sshll.u32 (!%p1825_p8), %s1877_s5, 8  ;;  %s152_s7 = scalar_lea.sflag (!%p1825_p8), [#allocation3], %s1877_s5 }
  0x29   : > { %s1883_s14 = scalar_lea.vmem (!%p1825_p8), [#allocation2], %s1392_s6 }
  0x2c   : > { %1733 = dma.done.wait (%p1812_p4), %s152_s7, 4096  }
  0x2d   : > { %1735 = vsyncadd (%p1812_p4), %s152_s7, 4294963200 }
  0x2e   : > { %1737 = dma.done.wait (%p40_p1), [#allocation6], 4096  }
  0x2f   : > { %1739 = vsyncadd (%p40_p1), [#allocation6], 4294963200  ;;  %v246_v0 = vld [vmem:[#allocation5 + $0xf0] sm:$0xff]  ;;  %v244_v1 = vld [vmem:[#allocation5 + $0xe0] sm:$0xff]  ;;  %vm638_vm0 = vcmask 523264   ;;  %s2426_s15 = scalar_lea.vmem [#allocation7], %s1392_s6 }
  0x30   : > { %248 = vmatpush.msra.mxu0 %v246_v0  ;;  %v242_v2 = vld [vmem:[#allocation5 + $0xd0] sm:$0xff]  ;;  %v240_v3 = vld [vmem:[#allocation5 + $0xc0] sm:$0xff]  ;;  %v1898_v17 = vld [vmem:[%s1883_s14 + $0x8] sm:$0xff]  ;;  %s1436_s20 = sshll.u32 %s1803_s13, 8  ;;  %s1297_s19 = sshll.u32 %s2426_s15, 4  ;;  %s1298_s19 = int_to_ptr.vmem [resolvable:$true] %s1297_s19 }
  0x31   : > { %v238_v4 = vld [vmem:[#allocation5 + $0xb0] sm:$0xff]  ;;  %v236_v5 = vld [vmem:[#allocation5 + $0xa0] sm:$0xff]  ;;  %v1906_v19 = vld [vmem:[%s1883_s14 + $0x38] sm:$0xff]  ;;  %s1296_s18 = scalar_lea.hbm %s2533_s2, %s1436_s20  ;;  %s1284_s22 = scalar_lea.sflag [#allocation4], %s1877_s5 }
  0x32   : > { %249 = vmatpush.msra.mxu0 %v244_v1  ;;  %v234_v6 = vld [vmem:[#allocation5 + $0x90] sm:$0xff]  ;;  %v232_v7 = vld [vmem:[#allocation5 + $0x80] sm:$0xff]  ;;  %482 = vmatpush.xpose.msra.mxu2 %v1906_v19  ;;  %v1913_v21 = vld [vmem:[%s1883_s14 + $0x18] sm:$0xff]  ;;  %s1299_s21 = sshll.u32 %s1296_s18, 4  ;;  %s1708_s27 = scalar_lea.hbm %s2533_s2, 512  ;;  %s1300_s21 = int_to_ptr.hbm [resolvable:$true] %s1299_s21 }
  0x33   : > { %v230_v8 = vld [vmem:[#allocation5 + $0x70] sm:$0xff]  ;;  %v228_v9 = vld [vmem:[#allocation5 + $0x60] sm:$0xff]  ;;  %v1918_v22 = vld [vmem:[%s1883_s14 + $0x28] sm:$0xff]  ;;  %s1702_s24 = sshra.s32 %s1300_s21, 4  ;;  %s1703_s24 = int_to_ptr.hbm [resolvable:$true] %s1702_s24 }
  0x34   : > { %250 = vmatpush.msra.mxu0 %v242_v2  ;;  %v226_v10 = vld [vmem:[#allocation5 + $0x50] sm:$0xff]  ;;  %v224_v11 = vld [vmem:[#allocation5 + $0x40] sm:$0xff]  ;;  %v1938_v25 = vld [vmem:[%s1883_s14 + $0x48] sm:$0xff]  ;;  %s1704_s25 = scalar_lea.hbm %s1703_s24, 256  ;;  %p1709_p11 = scmp.lt.s32.totalorder %s1703_s24, %s2533_s2 }
  0x35   : > { %v222_v12 = vld [vmem:[#allocation5 + $0x30] sm:$0xff]  ;;  %v220_v13 = vld [vmem:[#allocation5 + $0x20] sm:$0xff]  ;;  %v1946_v27 = vld [vmem:[%s1883_s14 + $0x78] sm:$0xff]  ;;  %p1705_p1 = scmp.ne.s32.totalorder %s1703_s24, %s1704_s25  ;;  %p1710_p9 = scmp.lt.s32.totalorder %s1708_s27, %s1704_s25 }
  0x36   : > { %251 = vmatpush.msra.mxu0 %v240_v3  ;;  %v218_v14 = vld [vmem:[#allocation5 + $0x10] sm:$0xff]  ;;  %v216_v15 = vld [vmem:[#allocation5] sm:$0xff]  ;;  %523 = vmatpush.xpose.msra.mxu3 %v1946_v27  ;;  %v1953_v29 = vld [vmem:[%s1883_s14 + $0x58] sm:$0xff] }
  0x37   : > { %v1894_v16 = vld [vmem:[%s1883_s14] sm:$0xff]  ;;  %v1902_v18 = vld [vmem:[%s1883_s14 + $0x10] sm:$0xff]  ;;  %v1958_v30 = vld [vmem:[%s1883_s14 + $0x68] sm:$0xff]  ;;  %p1706_p4 = pnand %p1705_p1, %p1849_p7  ;;  %p1711_p2 = por %p1710_p9, %p1709_p11 }
  0x38   : > { %252 = vmatpush.msra.mxu0 %v238_v4  ;;  %v1910_v20 = vld [vmem:[%s1883_s14 + $0x30] sm:$0xff]  ;;  %v1922_v23 = vld [vmem:[%s1883_s14 + $0x20] sm:$0xff]  ;;  %v1978_v35 = vld [vmem:[%s1883_s14 + $0x88] sm:$0xff] }
  0x39   : > { %483 = vmatpush.xpose.msra.mxu2 %v1910_v20  ;;  %v1934_v24 = vld [vmem:[%s1883_s14 + $0x40] sm:$0xff]  ;;  %v1942_v26 = vld [vmem:[%s1883_s14 + $0x50] sm:$0xff]  ;;  %v1986_v39 = vld [vmem:[%s1883_s14 + $0x98] sm:$0xff]  ;;  %p1707_p8 = pneg %p1706_p4 }
  0x3a   : > { %253 = vmatpush.msra.mxu0 %v236_v5  ;;  %v1950_v28 = vld [vmem:[%s1883_s14 + $0x70] sm:$0xff]  ;;  %v1962_v31 = vld [vmem:[%s1883_s14 + $0x60] sm:$0xff]  ;;  %v247_v42 = vld [vmem:[#allocation5 + $0xf8] sm:$0xff] }
  0x3b   : > { %524 = vmatpush.xpose.msra.mxu3 %v1950_v28  ;;  %v1974_v33 = vld [vmem:[%s1883_s14 + $0x80] sm:$0xff]  ;;  %v1982_v37 = vld [vmem:[%s1883_s14 + $0x90] sm:$0xff]  ;;  %361 = vmatpush.msra.mxu1 %v247_v42  ;;  %v245_v43 = vld [vmem:[#allocation5 + $0xe8] sm:$0xff]  ;;  %p1712_p10 = pnand %p1711_p2, %p1707_p8 }
  0x3c   : > { %254 = vmatpush.msra.mxu0 %v234_v6  ;;  %v1990_v41 = vld [vmem:[%s1883_s14 + $0xa0] sm:$0xff]  ;;  %v1993_v44 = vld [vmem:[%s1883_s14 + $0xb8] sm:$0xff]  ;;  %v241_v46 = vld [vmem:[#allocation5 + $0xc8] sm:$0xff] }
  0x3d   : > { %484 = vmatpush.xpose.msra.mxu2 %v1918_v22  ;;  %v243_v45 = vld [vmem:[#allocation5 + $0xd8] sm:$0xff]  ;;  %362 = vmatpush.msra.mxu1 %v245_v43  ;;  %v1998_v47 = vld [vmem:[%s1883_s14 + $0xb0] sm:$0xff]  ;;  %v2002_v49 = vld [vmem:[%s1883_s14 + $0xa8] sm:$0xff] }
  0x3e   : > { %255 = vmatpush.msra.mxu0 %v232_v7  ;;  %v239_v50 = vld [vmem:[#allocation5 + $0xb8] sm:$0xff]  ;;  %v237_v51 = vld [vmem:[#allocation5 + $0xa8] sm:$0xff]  ;;  %v2014_v1 = vld [vmem:[%s1883_s14 + $0xc0] sm:$0xff] }
  0x3f   : > { %525 = vmatpush.xpose.msra.mxu3 %v1958_v30  ;;  %363 = vmatpush.msra.mxu1 %v243_v45  ;;  %v235_v52 = vld [vmem:[#allocation5 + $0x98] sm:$0xff]  ;;  %v233_v53 = vld [vmem:[#allocation5 + $0x88] sm:$0xff]  ;;  %v2024_v5 = vld [vmem:[%s1883_s14 + $0xd0] sm:$0xff] }
  0x40   : > { %256 = vmatpush.msra.mxu0 %v230_v8  ;;  %v231_v55 = vld [vmem:[#allocation5 + $0x78] sm:$0xff]  ;;  %v229_v56 = vld [vmem:[#allocation5 + $0x68] sm:$0xff] }
  0x41   : > { %485 = vmatpush.xpose.msra.mxu2 %v1922_v23  ;;  %364 = vmatpush.msra.mxu1 %v241_v46  ;;  %v227_v57 = vld [vmem:[#allocation5 + $0x58] sm:$0xff]  ;;  %v225_v58 = vld [vmem:[#allocation5 + $0x48] sm:$0xff] }
  0x42   : > { %257 = vmatpush.msra.mxu0 %v228_v9  ;;  %v223_v60 = vld [vmem:[#allocation5 + $0x38] sm:$0xff]  ;;  %v221_v61 = vld [vmem:[#allocation5 + $0x28] sm:$0xff]  ;;  %v2034_v9 = vld [vmem:[%s1883_s14 + $0xe0] sm:$0xff] }
  0x43   : > { %526 = vmatpush.xpose.msra.mxu3 %v1962_v31  ;;  %365 = vmatpush.msra.mxu1 %v239_v50  ;;  %v219_v62 = vld [vmem:[#allocation5 + $0x18] sm:$0xff]  ;;  %v217_v63 = vld [vmem:[#allocation5 + $0x8] sm:$0xff] }
  0x44   : > { %258 = vmatpush.msra.mxu0 %v226_v10  ;;  %v2019_v3 = vld [vmem:[%s1883_s14 + $0xc8] sm:$0xff]  ;;  %v2029_v7 = vld [vmem:[%s1883_s14 + $0xd8] sm:$0xff] }
  0x45   : > { %486 = vmatpush.xpose.msra.mxu2 %v1913_v21  ;;  %366 = vmatpush.msra.mxu1 %v237_v51 }
  0x46   : > { %259 = vmatpush.msra.mxu0 %v224_v11  ;;  %v2039_v11 = vld [vmem:[%s1883_s14 + $0xe8] sm:$0xff] }
  0x47   : > { %527 = vmatpush.xpose.msra.mxu3 %v1953_v29  ;;  %367 = vmatpush.msra.mxu1 %v235_v52 }
  0x48   : > { %260 = vmatpush.msra.mxu0 %v222_v12  ;;  %v2044_v12 = vld [vmem:[%s1883_s14 + $0xf8] sm:$0xff] }
  0x49   : > { %487 = vmatpush.xpose.msra.mxu2 %v1902_v18  ;;  %368 = vmatpush.msra.mxu1 %v233_v53 }
  0x4a   : > { %261 = vmatpush.msra.mxu0 %v220_v13 }
  0x4b   : > { %528 = vmatpush.xpose.msra.mxu3 %v1942_v26  ;;  %369 = vmatpush.msra.mxu1 %v231_v55 }
  0x4c   : > { %262 = vmatpush.msra.mxu0 %v218_v14  ;;  %v2048_v14 = vld [vmem:[%s1883_s14 + $0xf0] sm:$0xff] }
  0x4d   : > { %488 = vmatpush.xpose.msra.mxu2 %v1898_v17  ;;  %370 = vmatpush.msra.mxu1 %v229_v56 }
  0x4e   : > { %263 = vmatpush.msra.mxu0 %v216_v15 }
  0x4f   : > { %264 = vmatmul.f32.vlgmr.msra.gmra.mxu0 %v1894_v16  ;;  %529 = vmatpush.xpose.msra.mxu3 %v1938_v25 }
  0x50   : > { %371 = vmatpush.msra.mxu1 %v227_v57 }
  0x51   : > { %489 = vmatpush.xpose.msra.mxu2 %v1894_v16 }
  0x52   : > { %372 = vmatpush.msra.mxu1 %v225_v58 }
  0x53   : > { %530 = vmatpush.xpose.msra.mxu3 %v1934_v24 }
  0x54   : > { %373 = vmatpush.msra.mxu1 %v223_v60 }
  0x55   : > { %564 = vmatpush.xpose.msrb.mxu2 %v1993_v44 }
  0x56   : > { %374 = vmatpush.msra.mxu1 %v221_v61 }
  0x57   : > { %267 = vmatmul.f32.gmra.mxu0 %v1898_v17  ;;  %605 = vmatpush.xpose.msrb.mxu3 %v2044_v12 }
  0x58   : > { %375 = vmatpush.msra.mxu1 %v219_v62 }
  0x59   : > { %565 = vmatpush.xpose.msrb.mxu2 %v1998_v47 }
  0x5a   : > { %376 = vmatpush.msra.mxu1 %v217_v63 }
  0x5b   : > { %377 = vmatmul.f32.vlgmr.msra.gmra.mxu1 %v1894_v16  ;;  %606 = vmatpush.xpose.msrb.mxu3 %v2048_v14 }
  0x5d   : > { %566 = vmatpush.xpose.msrb.mxu2 %v2002_v49 }
  0x5f   : > { %270 = vmatmul.f32.gmra.mxu0 %v1902_v18  ;;  %607 = vmatpush.xpose.msrb.mxu3 %v2039_v11 }
  0x61   : > { %567 = vmatpush.xpose.msrb.mxu2 %v1990_v41 }
  0x63   : > { %380 = vmatmul.f32.gmra.mxu1 %v1898_v17  ;;  %608 = vmatpush.xpose.msrb.mxu3 %v2034_v9 }
  0x65   : > { %568 = vmatpush.xpose.msrb.mxu2 %v1986_v39 }
  0x67   : > { %273 = vmatmul.f32.gmra.mxu0 %v1913_v21  ;;  %609 = vmatpush.xpose.msrb.mxu3 %v2029_v7 }
  0x69   : > { %569 = vmatpush.xpose.msrb.mxu2 %v1982_v37 }
  0x6b   : > { %383 = vmatmul.f32.gmra.mxu1 %v1902_v18  ;;  %610 = vmatpush.xpose.msrb.mxu3 %v2024_v5 }
  0x6d   : > { %570 = vmatpush.xpose.msrb.mxu2 %v1978_v35 }
  0x6f   : > { %276 = vmatmul.f32.gmra.mxu0 %v1922_v23  ;;  %611 = vmatpush.xpose.msrb.mxu3 %v2019_v3 }
  0x71   : > { %571 = vmatpush.xpose.msrb.mxu2 %v1974_v33 }
  0x73   : > { %386 = vmatmul.f32.gmra.mxu1 %v1913_v21  ;;  %612 = vmatpush.xpose.msrb.mxu3 %v2014_v1 }
  0x77   : > { %279 = vmatmul.f32.gmra.mxu0 %v1918_v22 }
  0x7b   : > { %389 = vmatmul.f32.gmra.mxu1 %v1922_v23 }
  0x7f   : > { %282 = vmatmul.f32.gmra.mxu0 %v1910_v20 }
  0x83   : > { %392 = vmatmul.f32.gmra.mxu1 %v1918_v22 }
  0x87   : > { %285 = vmatmul.f32.gmra.mxu0 %v1906_v19 }
  0x8b   : > { %395 = vmatmul.f32.gmra.mxu1 %v1910_v20 }
  0x8f   : > { %288 = vmatmul.f32.gmra.mxu0 %v1934_v24 }
  0x93   : > { %398 = vmatmul.f32.gmra.mxu1 %v1906_v19 }
  0x97   : > { %291 = vmatmul.f32.gmra.mxu0 %v1938_v25 }
  0x9b   : > { %401 = vmatmul.f32.gmra.mxu1 %v1934_v24 }
  0x9f   : > { %294 = vmatmul.f32.gmra.mxu0 %v1942_v26 }
  0xa3   : > { %404 = vmatmul.f32.gmra.mxu1 %v1938_v25 }
  0xa7   : > { %297 = vmatmul.f32.gmra.mxu0 %v1953_v29 }
  0xab   : > { %407 = vmatmul.f32.gmra.mxu1 %v1942_v26 }
  0xaf   : > { %300 = vmatmul.f32.gmra.mxu0 %v1962_v31 }
  0xb3   : > { %410 = vmatmul.f32.gmra.mxu1 %v1953_v29 }
  0xb7   : > { %303 = vmatmul.f32.gmra.mxu0 %v1958_v30 }
  0xbb   : > { %413 = vmatmul.f32.gmra.mxu1 %v1962_v31 }
  0xbf   : > { %306 = vmatmul.f32.gmra.mxu0 %v1950_v28 }
  0xc3   : > { %416 = vmatmul.f32.gmra.mxu1 %v1958_v30 }
  0xc7   : > { %309 = vmatmul.f32.gmra.mxu0 %v1946_v27 }
  0xcb   : > { %419 = vmatmul.f32.gmra.mxu1 %v1950_v28 }
  0xcc   : > { %v265_v32 = vpop.f32.mrf.mxu0 }
  0xcd   : > { %490 = vmatmul.f32.vlgmr.msra.gmra.mxu2 %v265_v32 }
  0xcf   : > { %312 = vmatmul.f32.gmra.mxu0 %v1974_v33 }
  0xd3   : > { %422 = vmatmul.f32.gmra.mxu1 %v1946_v27 }
  0xd4   : > { %v268_v34 = vpop.f32.mrf.mxu0 }
  0xd5   : > { %493 = vmatmul.f32.gmra.mxu2 %v268_v34 }
  0xd7   : > { %315 = vmatmul.f32.gmra.mxu0 %v1978_v35 }
  0xd8   : > { %v2091_v43 = vpop.f32.mrf.mxu1 }
  0xdb   : > { %425 = vmatmul.f32.gmra.mxu1 %v1974_v33 }
  0xdc   : > { %v271_v36 = vpop.f32.mrf.mxu0 }
  0xdd   : > { %496 = vmatmul.f32.gmra.mxu2 %v271_v36 }
  0xdf   : > { %318 = vmatmul.f32.gmra.mxu0 %v1982_v37 }
  0xe3   : > { %428 = vmatmul.f32.gmra.mxu1 %v1978_v35 }
  0xe4   : > { %v274_v38 = vpop.f32.mrf.mxu0 }
  0xe5   : > { %499 = vmatmul.f32.gmra.mxu2 %v274_v38 }
  0xe7   : > { %321 = vmatmul.f32.gmra.mxu0 %v1986_v39 }
  0xeb   : > { %431 = vmatmul.f32.gmra.mxu1 %v1982_v37 }
  0xec   : > { %v277_v40 = vpop.f32.mrf.mxu0 }
  0xed   : > { %502 = vmatmul.f32.gmra.mxu2 %v277_v40 }
  0xef   : > { %324 = vmatmul.f32.gmra.mxu0 %v1990_v41 }
  0xf3   : > { %434 = vmatmul.f32.gmra.mxu1 %v1986_v39 }
  0xf4   : > { %v280_v48 = vpop.f32.mrf.mxu0 }
  0xf5   : > { %505 = vmatmul.f32.gmra.mxu2 %v280_v48  ;;  %v2098_v48 = vpop.f32.mrf.mxu1 }
  0xf7   : > { %327 = vmatmul.f32.gmra.mxu0 %v2002_v49 }
  0xfb   : > { %437 = vmatmul.f32.gmra.mxu1 %v1990_v41 }
  0xfc   : > { %v283_v54 = vpop.f32.mrf.mxu0 }
  0xfd   : > { %508 = vmatmul.f32.gmra.mxu2 %v283_v54  ;;  %v384_v52 = vpop.f32.mrf.mxu1 }
  0xff   : > { %330 = vmatmul.f32.gmra.mxu0 %v1998_v47 }
 0x103   : > { %440 = vmatmul.f32.gmra.mxu1 %v2002_v49 }
 0x104   : > { %v286_v59 = vpop.f32.mrf.mxu0 }
 0x105   : > { %511 = vmatmul.f32.gmra.mxu2 %v286_v59  ;;  %v387_v58 = vpop.f32.mrf.mxu1 }
 0x107   : > { %333 = vmatmul.f32.gmra.mxu0 %v1993_v44 }
 0x10b   : > { %443 = vmatmul.f32.gmra.mxu1 %v1998_v47 }
 0x10c   : > { %v289_v0 = vpop.f32.mrf.mxu0 }
 0x10d   : > { %531 = vmatmul.f32.vlgmr.msra.gmra.mxu3 %v289_v0  ;;  %v390_v61 = vpop.f32.mrf.mxu1 }
 0x10f   : > { %336 = vmatmul.f32.gmra.mxu0 %v2014_v1 }
 0x113   : > { %446 = vmatmul.f32.gmra.mxu1 %v1993_v44 }
 0x114   : > { %v292_v2 = vpop.f32.mrf.mxu0 }
 0x115   : > { %534 = vmatmul.f32.gmra.mxu3 %v292_v2  ;;  %v393_v2 = vpop.f32.mrf.mxu1 }
 0x117   : > { %339 = vmatmul.f32.gmra.mxu0 %v2019_v3 }
 0x11b   : > { %449 = vmatmul.f32.gmra.mxu1 %v2014_v1 }
 0x11c   : > { %v295_v4 = vpop.f32.mrf.mxu0 }
 0x11d   : > { %537 = vmatmul.f32.gmra.mxu3 %v295_v4 }
 0x11f   : > { %342 = vmatmul.f32.gmra.mxu0 %v2024_v5 }
 0x123   : > { %452 = vmatmul.f32.gmra.mxu1 %v2019_v3 }
 0x124   : > { %v298_v6 = vpop.f32.mrf.mxu0 }
 0x125   : > { %540 = vmatmul.f32.gmra.mxu3 %v298_v6 }
 0x127   : > { %345 = vmatmul.f32.gmra.mxu0 %v2029_v7 }
 0x12b   : > { %455 = vmatmul.f32.gmra.mxu1 %v2024_v5 }
 0x12c   : > { %v301_v8 = vpop.f32.mrf.mxu0 }
 0x12d   : > { %543 = vmatmul.f32.gmra.mxu3 %v301_v8  ;;  %v396_v8 = vpop.f32.mrf.mxu1 }
 0x12f   : > { %348 = vmatmul.f32.gmra.mxu0 %v2034_v9 }
 0x133   : > { %458 = vmatmul.f32.gmra.mxu1 %v2029_v7 }
 0x134   : > { %v304_v10 = vpop.f32.mrf.mxu0 }
 0x135   : > { %546 = vmatmul.f32.gmra.mxu3 %v304_v10 }
 0x137   : > { %351 = vmatmul.f32.gmra.mxu0 %v2039_v11 }
 0x13b   : > { %461 = vmatmul.f32.gmra.mxu1 %v2034_v9 }
 0x13c   : > { %v307_v13 = vpop.f32.mrf.mxu0 }
 0x13d   : > { %549 = vmatmul.f32.gmra.mxu3 %v307_v13 }
 0x13f   : > { %354 = vmatmul.f32.gmra.mxu0 %v2048_v14 }
 0x143   : > { %464 = vmatmul.f32.gmra.mxu1 %v2039_v11 }
 0x144   : > { %v310_v15 = vpop.f32.mrf.mxu0 }
 0x145   : > { %552 = vmatmul.f32.gmra.mxu3 %v310_v15  ;;  %v399_v15 = vpop.f32.mrf.mxu1 }
 0x146   : > { %1023 = vmatpush.msra.mxu2 %v399_v15 }
 0x147   : > { %357 = vmatmul.f32.gmra.mxu0 %v2044_v12 }
 0x148   : > { %1024 = vmatpush.msra.mxu2 %v396_v8 }
 0x14a   : > { %1025 = vmatpush.msra.mxu2 %v393_v2 }
 0x14b   : > { %467 = vmatmul.f32.gmra.mxu1 %v2048_v14 }
 0x14c   : > { %v313_v16 = vpop.f32.mrf.mxu0  ;;  %1026 = vmatpush.msra.mxu2 %v390_v61 }
 0x14d   : > { %572 = vmatmul.f32.vlgmr.msrb.gmra.mxu2 %v313_v16 }
 0x14e   : > { %1027 = vmatpush.msra.mxu2 %v387_v58 }
 0x150   : > { %v2060_v17 = vpop.f32.mrf.mxu2  ;;  %1028 = vmatpush.msra.mxu2 %v384_v52 }
 0x151   : > { %v639_v18 = vsel %vm638_vm0, %v2060_v17, -inf }
 0x152   : > { %640 = vmax.xlane.f32.xlu0 %v639_v18  ;;  %1029 = vmatpush.msra.mxu2 %v2098_v48 }
 0x153   : > { %470 = vmatmul.f32.gmra.mxu1 %v2044_v12 }
 0x154   : > { %v316_v19 = vpop.f32.mrf.mxu0  ;;  %1030 = vmatpush.msra.mxu2 %v2091_v43 }
 0x155   : > { %575 = vmatmul.f32.gmra.mxu2 %v316_v19 }
 0x158   : > { %v2067_v20 = vpop.f32.mrf.mxu2 }
 0x159   : > { %v642_v21 = vsel %vm638_vm0, %v2067_v20, -inf }
 0x15a   : > { %643 = vmax.xlane.f32.xlu1 %v642_v21 }
 0x15c   : > { %v319_v22 = vpop.f32.mrf.mxu0 }
 0x15d   : > { %578 = vmatmul.f32.gmra.mxu2 %v319_v22  ;;  %v2146_v22 = vpop.f32.mrf.mxu1 }
 0x160   : > { %v2072_v23 = vpop.f32.mrf.mxu2 }
 0x161   : > { %v645_v24 = vsel %vm638_vm0, %v2072_v23, -inf }
 0x162   : > { %646 = vmax.xlane.f32.xlu2 %v645_v24 }
 0x164   : > { %v322_v25 = vpop.f32.mrf.mxu0 }
 0x165   : > { %581 = vmatmul.f32.gmra.mxu2 %v322_v25 }
 0x168   : > { %v2077_v32 = vpop.f32.mrf.mxu2 }
 0x169   : > { %v648_v33 = vsel %vm638_vm0, %v2077_v32, -inf }
 0x16c   : > { %v325_v34 = vpop.f32.mrf.mxu0 }
 0x16d   : > { %584 = vmatmul.f32.gmra.mxu2 %v325_v34 }
 0x170   : > { %v2080_v36 = vpop.f32.mrf.mxu2 }
 0x171   : > { %v651_v26 = vsel %vm638_vm0, %v2080_v36, -inf }
 0x172   : > { %652 = vmax.xlane.f32.xlu2 %v651_v26 }
 0x174   : > { %v328_v38 = vpop.f32.mrf.mxu0 }
 0x175   : > { %587 = vmatmul.f32.gmra.mxu2 %v328_v38  ;;  %v405_v38 = vpop.f32.mrf.mxu1 }
 0x178   : > { %v2085_v40 = vpop.f32.mrf.mxu2 }
 0x179   : > { %v654_v29 = vsel %vm638_vm0, %v2085_v40, -inf }
 0x17a   : > { %655 = vmax.xlane.f32.xlu1 %v654_v29 }
 0x17c   : > { %v331_v42 = vpop.f32.mrf.mxu0 }
 0x17d   : > { %590 = vmatmul.f32.gmra.mxu2 %v331_v42 }
 0x180   : > { %v2100_v28 = vpop.f32.mrf.mxu2 }
 0x181   : > { %v657_v35 = vsel %vm638_vm0, %v2100_v28, -inf }
 0x184   : > { %v334_v31 = vpop.f32.mrf.mxu0 }
 0x185   : > { %593 = vmatmul.f32.gmra.mxu2 %v334_v31 }
 0x188   : > { %v2110_v54 = vpop.f32.mrf.mxu2 }
 0x189   : > { %v660_v56 = vsel %vm638_vm0, %v2110_v54, -inf }
 0x18c   : > { %v337_v45 = vpop.f32.mrf.mxu0 }
 0x18d   : > { %613 = vmatmul.f32.vlgmr.msrb.gmra.mxu3 %v337_v45 }
 0x190   : > { %v2094_v30 = vpop.f32.mrf.mxu3 }
 0x191   : > { %v663_v46 = vsel %vm638_vm0, %v2094_v30, -inf }
 0x192   : > { %664 = vmax.xlane.f32.xlu0 %v663_v46  ;;  %v408_v46 = vpop.f32.mrf.mxu1 }
 0x194   : > { %v340_v50 = vpop.f32.mrf.mxu0 }
 0x195   : > { %616 = vmatmul.f32.gmra.mxu3 %v340_v50 }
 0x198   : > { %v2103_v27 = vpop.f32.mrf.mxu3 }
 0x199   : > { %v666_v51 = vsel %vm638_vm0, %v2103_v27, -inf }
 0x19a   : > { %649 = vmax.xlane.f32.xlu0 %v648_v33  ;;  %667 = vmax.xlane.f32.xlu1 %v666_v51  ;;  %v411_v50 = vpop.f32.mrf.mxu1 }
 0x19c   : > { %v343_v53 = vpop.f32.mrf.mxu0 }
 0x19d   : > { %619 = vmatmul.f32.gmra.mxu3 %v343_v53 }
 0x1a0   : > { %v2112_v55 = vpop.f32.mrf.mxu3 }
 0x1a1   : > { %v669_v57 = vsel %vm638_vm0, %v2112_v55, -inf }
 0x1a2   : > { %658 = vmax.xlane.f32.xlu0 %v657_v35  ;;  %661 = vmax.xlane.f32.xlu1 %v660_v56  ;;  %v414_v35 = vpop.f32.mrf.mxu1 }
 0x1a3   : > { %670 = vmax.xlane.f32.xlu2 %v669_v57 }
 0x1a4   : > { %v346_v59 = vpop.f32.mrf.mxu0 }
 0x1a5   : > { %622 = vmatmul.f32.gmra.mxu3 %v346_v59 }
 0x1a8   : > { %v2121_v37 = vpop.f32.mrf.mxu3 }
 0x1a9   : > { %v672_v60 = vsel %vm638_vm0, %v2121_v37, -inf }
 0x1aa   : > { %673 = vmax.xlane.f32.xlu1 %v672_v60  ;;  %v417_v58 = vpop.f32.mrf.mxu1 }
 0x1ac   : > { %v349_v62 = vpop.f32.mrf.mxu0 }
 0x1ad   : > { %625 = vmatmul.f32.gmra.mxu3 %v349_v62 }
 0x1b0   : > { %v2126_v63 = vpop.f32.mrf.mxu3 }
 0x1b1   : > { %v675_v0 = vsel %vm638_vm0, %v2126_v63, -inf }
 0x1b2   : > { %676 = vmax.xlane.f32.xlu0 %v675_v0  ;;  %v420_v7 = vpop.f32.mrf.mxu1 }
 0x1b4   : > { %v352_v39 = vpop.f32.mrf.mxu0 }
 0x1b5   : > { %628 = vmatmul.f32.gmra.mxu3 %v352_v39 }
 0x1b8   : > { %v2131_v4 = vpop.f32.mrf.mxu3 }
 0x1b9   : > { %v678_v6 = vsel %vm638_vm0, %v2131_v4, -inf }
 0x1ba   : > { %679 = vmax.xlane.f32.xlu2 %v678_v6 }
 0x1bc   : > { %v355_v41 = vpop.f32.mrf.mxu0 }
 0x1bd   : > { %631 = vmatmul.f32.gmra.mxu3 %v355_v41 }
 0x1c0   : > { %v2136_v10 = vpop.f32.mrf.mxu3 }
 0x1c1   : > { %v681_v13 = vsel %vm638_vm0, %v2136_v10, -inf }
 0x1c2   : > { %682 = vmax.xlane.f32.xlu1 %v681_v13 }
 0x1c4   : > { %v358_v49 = vpop.f32.mrf.mxu0 }
 0x1c5   : > { %v641_v16 = vpop.xlane.xlu0 %640  ;;  %634 = vmatmul.f32.gmra.mxu3 %v358_v49 }
 0x1c6   : > { %v735_v18 = vsub.f32 %v2060_v17, %v641_v16 }
 0x1c8   : > { %v767_v19 = vmul.f32 1.442695, %v735_v18  ;;  %v2142_v47 = vpop.f32.mrf.mxu3 }
 0x1c9   : > { %v684_v21 = vsel %vm638_vm0, %v2142_v47, -inf }
 0x1ca   : > { %1500 = vpow2.f32 %v767_v19  ;;  %685 = vmax.xlane.f32.xlu2 %v684_v21 }
 0x1cd   : > { %v644_v44 = vpop.xlane.xlu1 %643 }
 0x1ce   : > { %v736_v24 = vsub.f32 %v2067_v20, %v644_v44 }
 0x1d0   : > { %v2151_v17 = vpop.eup %1500  ;;  %v769_v25 = vmul.f32 1.442695, %v736_v24  ;;  %v2153_v34 = vpop.f32.mrf.mxu2 }
 0x1d1   : > { %v831_v26 = vsel %vm638_vm0, %v2151_v17, 0.0  ;;  %v687_v29 = vsel %vm638_vm0, %v2153_v34, -inf }
 0x1d2   : > { %1502 = vpow2.f32 %v769_v25  ;;  %832 = vadd.xlane.f32.xlu2 %v831_v26 }
 0x1d5   : > { %v647_v1 = vpop.xlane.xlu2 %646 }
 0x1d6   : > { %v737_v20 = vsub.f32 %v2072_v23, %v647_v1 }
 0x1d8   : > { %v2162_v42 = vpop.eup %1502  ;;  %v771_v31 = vmul.f32 1.442695, %v737_v20  ;;  %v2166_v43 = vpop.f32.mrf.mxu2 }
 0x1d9   : > { %v834_v45 = vsel %vm638_vm0, %v2162_v42, 0.0  ;;  %v690_v3 = vsel %vm638_vm0, %v2166_v43, -inf }
 0x1da   : > { %1504 = vpow2.f32 %v771_v31  ;;  %835 = vadd.xlane.f32.xlu0 %v834_v45  ;;  %688 = vmax.xlane.f32.xlu2 %v687_v29 }
 0x1e0   : > { %v2171_v23 = vpop.eup %1504  ;;  %v2175_v33 = vpop.f32.mrf.mxu2 }
 0x1e1   : > { %v837_v48 = vsel %vm638_vm0, %v2171_v23, 0.0  ;;  %v693_v5 = vsel %vm638_vm0, %v2175_v33, -inf }
 0x1e2   : > { %838 = vadd.xlane.f32.xlu1 %v837_v48  ;;  %691 = vmax.xlane.f32.xlu0 %v690_v3 }
 0x1e5   : > { %v653_v51 = vpop.xlane.xlu2 %652 }
 0x1e6   : > { %v739_v52 = vsub.f32 %v2080_v36, %v653_v51  ;;  %v423_v36 = vpop.f32.mrf.mxu1 }
 0x1e7   : > { %1088 = vmatpush.msra.mxu3 %v423_v36 }
 0x1e8   : > { %v775_v53 = vmul.f32 1.442695, %v739_v52 }
 0x1e9   : > { %1089 = vmatpush.msra.mxu3 %v420_v7 }
 0x1ea   : > { %1506 = vpow2.f32 %v775_v53  ;;  %694 = vmax.xlane.f32.xlu1 %v693_v5 }
 0x1eb   : > { %1090 = vmatpush.msra.mxu3 %v417_v58 }
 0x1ed   : > { %v656_v59 = vpop.xlane.xlu1 %655  ;;  %1091 = vmatpush.msra.mxu3 %v414_v35 }
 0x1ee   : > { %v2190_v62 = vpop.f32.mrf.mxu1  ;;  %v740_v8 = vsub.f32 %v2085_v40, %v656_v59 }
 0x1ef   : > { %1092 = vmatpush.msra.mxu3 %v411_v50 }
 0x1f0   : > { %v2182_v56 = vpop.eup %1506  ;;  %v777_v13 = vmul.f32 1.442695, %v740_v8 }
 0x1f1   : > { %v843_v57 = vsel %vm638_vm0, %v2182_v56, 0.0  ;;  %1093 = vmatpush.msra.mxu3 %v408_v46 }
 0x1f2   : > { %844 = vadd.xlane.f32.xlu0 %v843_v57 }
 0x1f3   : > { %1094 = vmatpush.msra.mxu3 %v405_v38 }
 0x1f5   : > { %1095 = vmatpush.msra.mxu3 %v2146_v22 }
 0x205   : > { %v665_v60 = vpop.xlane.xlu0 %664 }
 0x206   : > { %v743_v9 = vsub.f32 %v2094_v30, %v665_v60 }
 0x208   : > { %v783_v61 = vmul.f32 1.442695, %v743_v9 }
 0x20a   : > { %1508 = vpow2.f32 %v783_v61 }
 0x20d   : > { %v650_v0 = vpop.xlane.xlu0 %649  ;;  %v668_v11 = vpop.xlane.xlu1 %667 }
 0x20e   : > { %v738_v14 = vsub.f32 %v2077_v32, %v650_v0  ;;  %v744_v2 = vsub.f32 %v2103_v27, %v668_v11  ;;  %v2202_v32 = vpop.f32.mrf.mxu2  ;;  %v2204_v27 = vpop.f32.mrf.mxu1 }
 0x20f   : > { %v696_v45 = vsel %vm638_vm0, %v2202_v32, -inf }
 0x210   : > { %v2194_v12 = vpop.eup %1508  ;;  %v773_v39 = vmul.f32 1.442695, %v738_v14  ;;  %v785_v6 = vmul.f32 1.442695, %v744_v2  ;;  %v2196_v30 = vpop.f32.mrf.mxu3 }
 0x211   : > { %v855_v41 = vsel %vm638_vm0, %v2194_v12, 0.0  ;;  %v711_v16 = vsel %vm638_vm0, %v2196_v30, -inf }
 0x212   : > { %1510 = vpow2.f32 %v773_v39  ;;  %856 = vadd.xlane.f32.xlu0 %v855_v41 }
 0x213   : > { %1512 = vpow2.f32 %v785_v6 }
 0x214   : > { %1514 = vpow2.f32 %v777_v13 }
 0x215   : > { %v662_v15 = vpop.xlane.xlu1 %661  ;;  %v659_v26 = vpop.xlane.xlu0 %658 }
 0x216   : > { %v671_v49 = vpop.xlane.xlu2 %670  ;;  %v2219_v25 = vpop.f32.mrf.mxu1  ;;  %v741_v52 = vsub.f32 %v2100_v28, %v659_v26  ;;  %v742_v53 = vsub.f32 %v2110_v54, %v662_v15 }
 0x217   : > { %v745_v18 = vsub.f32 %v2112_v55, %v671_v49  ;;  %v2221_v55 = vpop.f32.mrf.mxu2 }
 0x218   : > { %v2208_v40 = vpop.eup %1510  ;;  %v2211_v19 = vpop.f32.mrf.mxu3  ;;  %v699_v46 = vsel %vm638_vm0, %v2221_v55, -inf  ;;  %v779_v28 = vmul.f32 1.442695, %v741_v52 }
 0x219   : > { %v2213_v21 = vpop.eup %1512  ;;  %v840_v22 = vsel %vm638_vm0, %v2208_v40, 0.0  ;;  %v787_v24 = vmul.f32 1.442695, %v745_v18  ;;  %v714_v57 = vsel %vm638_vm0, %v2211_v19, -inf }
 0x21a   : > { %841 = vadd.xlane.f32.xlu2 %v840_v22  ;;  %v858_v44 = vsel %vm638_vm0, %v2213_v21, 0.0  ;;  %712 = vmax.xlane.f32.xlu0 %v711_v16  ;;  %v2224_v20 = vpop.eup %1514 }
 0x21b   : > { %859 = vadd.xlane.f32.xlu1 %v858_v44  ;;  %1516 = vpow2.f32 %v787_v24  ;;  %v846_v3 = vsel %vm638_vm0, %v2224_v20, 0.0 }
 0x21d   : > { %v674_v38 = vpop.xlane.xlu1 %673 }
 0x21e   : > { %v746_v1 = vsub.f32 %v2121_v37, %v674_v38  ;;  %v2234_v37 = vpop.f32.mrf.mxu1 }
 0x21f   : > { %v2267_v15 = vpop.f32.mrf.mxu2 }
 0x220   : > { %v789_v29 = vmul.f32 1.442695, %v746_v1  ;;  %v2226_v31 = vpop.f32.mrf.mxu3  ;;  %v702_v18 = vsel %vm638_vm0, %v2267_v15, -inf }
 0x221   : > { %v2236_v50 = vpop.eup %1516  ;;  %v717_v60 = vsel %vm638_vm0, %v2226_v31, -inf }
 0x222   : > { %1518 = vpow2.f32 %v789_v29  ;;  %697 = vmax.xlane.f32.xlu2 %v696_v45  ;;  %700 = vmax.xlane.f32.xlu0 %v699_v46  ;;  %v861_v7 = vsel %vm638_vm0, %v2236_v50, 0.0 }
 0x223   : > { %847 = vadd.xlane.f32.xlu1 %v846_v3 }
 0x225   : > { %v677_v48 = vpop.xlane.xlu0 %676 }
 0x226   : > { %v747_v51 = vsub.f32 %v2126_v63, %v677_v48  ;;  %v781_v63 = vmul.f32 1.442695, %v742_v53  ;;  %v438_v54 = vpop.f32.mrf.mxu1 }
 0x227   : > { %v2288_v3 = vpop.f32.mrf.mxu2 }
 0x228   : > { %v2240_v5 = vpop.eup %1518  ;;  %v791_v35 = vmul.f32 1.442695, %v747_v51  ;;  %v2245_v58 = vpop.f32.mrf.mxu3 }
 0x229   : > { %v864_v36 = vsel %vm638_vm0, %v2240_v5, 0.0  ;;  %v720_v9 = vsel %vm638_vm0, %v2245_v58, -inf }
 0x22a   : > { %1520 = vpow2.f32 %v791_v35  ;;  %862 = vadd.xlane.f32.xlu2 %v861_v7  ;;  %865 = vadd.xlane.f32.xlu0 %v864_v36 }
 0x22b   : > { %715 = vmax.xlane.f32.xlu1 %v714_v57  ;;  %1522 = vpow2.f32 %v779_v28 }
 0x22c   : > { %1524 = vpow2.f32 %v781_v63 }
 0x22d   : > { %v680_v59 = vpop.xlane.xlu2 %679 }
 0x22e   : > { %v748_v0 = vsub.f32 %v2131_v4, %v680_v59  ;;  %v441_v8 = vpop.f32.mrf.mxu1 }
 0x22f   : > { %v2301_v59 = vpop.f32.mrf.mxu2 }
 0x230   : > { %v2255_v61 = vpop.eup %1520  ;;  %v2258_v11 = vpop.f32.mrf.mxu3  ;;  %v793_v2 = vmul.f32 1.442695, %v748_v0 }
 0x231   : > { %v867_v14 = vsel %vm638_vm0, %v2255_v61, 0.0  ;;  %v2262_v39 = vpop.eup %1522  ;;  %v723_v29 = vsel %vm638_vm0, %v2258_v11, -inf }
 0x232   : > { %718 = vmax.xlane.f32.xlu2 %v717_v60  ;;  %721 = vmax.xlane.f32.xlu0 %v720_v9  ;;  %v2264_v41 = vpop.eup %1524  ;;  %1526 = vpow2.f32 %v793_v2  ;;  %v849_v49 = vsel %vm638_vm0, %v2262_v39, 0.0 }
 0x233   : > { %868 = vadd.xlane.f32.xlu1 %v867_v14  ;;  %v852_v16 = vsel %vm638_vm0, %v2264_v41, 0.0  ;;  %v705_v14 = vsel %vm638_vm0, %v2288_v3, -inf }
 0x235   : > { %v683_v6 = vpop.xlane.xlu1 %682 }
 0x236   : > { %v749_v13 = vsub.f32 %v2136_v10, %v683_v6  ;;  %v444_v44 = vpop.f32.mrf.mxu1 }
 0x238   : > { %v795_v4 = vmul.f32 1.442695, %v749_v13  ;;  %v2275_v22 = vpop.f32.mrf.mxu3  ;;  %v2277_v24 = vpop.eup %1526 }
 0x239   : > { %v870_v45 = vsel %vm638_vm0, %v2277_v24, 0.0  ;;  %v726_v52 = vsel %vm638_vm0, %v2275_v22, -inf }
 0x23a   : > { %1528 = vpow2.f32 %v795_v4  ;;  %850 = vadd.xlane.f32.xlu2 %v849_v49  ;;  %853 = vadd.xlane.f32.xlu0 %v852_v16 }
 0x23b   : > { %703 = vmax.xlane.f32.xlu1 %v702_v18 }
 0x23d   : > { %v686_v10 = vpop.xlane.xlu2 %685 }
 0x23e   : > { %v750_v26 = vsub.f32 %v2142_v47, %v686_v10  ;;  %v447_v51 = vpop.f32.mrf.mxu1 }
 0x23f   : > { %1153 = vmatpush.msrb.mxu2 %v447_v51 }
 0x240   : > { %v2280_v38 = vpop.eup %1528  ;;  %v797_v1 = vmul.f32 1.442695, %v750_v26  ;;  %v2290_v48 = vpop.f32.mrf.mxu3 }
 0x241   : > { %v873_v46 = vsel %vm638_vm0, %v2280_v38, 0.0  ;;  %v729_v53 = vsel %vm638_vm0, %v2290_v48, -inf  ;;  %1154 = vmatpush.msrb.mxu2 %v444_v44 }
 0x242   : > { %1530 = vpow2.f32 %v797_v1  ;;  %871 = vadd.xlane.f32.xlu2 %v870_v45  ;;  %874 = vadd.xlane.f32.xlu0 %v873_v46 }
 0x243   : > { %724 = vmax.xlane.f32.xlu1 %v723_v29  ;;  %1155 = vmatpush.msrb.mxu2 %v441_v8 }
 0x245   : > { %v833_v47 = vpop.xlane.xlu2 %832  ;;  %1156 = vmatpush.msrb.mxu2 %v438_v54 }
 0x246   : > { %1532 = vrcp.f32 %v833_v47  ;;  %v2304_v9 = vpop.f32.mrf.mxu1 }
 0x247   : > { %1157 = vmatpush.msrb.mxu2 %v2234_v37 }
 0x248   : > { %v2296_v35 = vpop.eup %1530 }
 0x249   : > { %v876_v57 = vsel %vm638_vm0, %v2296_v35, 0.0  ;;  %1158 = vmatpush.msrb.mxu2 %v2219_v25  ;;  %v2321_v25 = vpop.f32.mrf.mxu3 }
 0x24a   : > { %727 = vmax.xlane.f32.xlu2 %v726_v52  ;;  %730 = vmax.xlane.f32.xlu0 %v729_v53  ;;  %v732_v16 = vsel %vm638_vm0, %v2321_v25, -inf }
 0x24b   : > { %877 = vadd.xlane.f32.xlu1 %v876_v57  ;;  %1159 = vmatpush.msrb.mxu2 %v2204_v27 }
 0x24c   : > { %v1533_v7 = vpop.eup %1532 }
 0x24d   : > { %v959_v36 = vmul.f32 %v1533_v7, %v2151_v17  ;;  %v836_v28 = vpop.xlane.xlu0 %835  ;;  %v689_v63 = vpop.xlane.xlu2 %688  ;;  %v708_v17 = vsel %vm638_vm0, %v2301_v59, -inf  ;;  %1160 = vmatpush.msrb.mxu2 %v2190_v62 }
 0x24e   : > { %1534 = vrcp.f32 %v836_v28  ;;  %v751_v60 = vsub.f32 %v2153_v34, %v689_v63  ;;  %v453_v6 = vpop.f32.mrf.mxu1 }
 0x24f   : > { %1395 = vmatmul.msk.f32.vlgmr.msra.gmra.mxu2 %vm638_vm0, %v959_v36 }
 0x250   : > { %v799_v0 = vmul.f32 1.442695, %v751_v60 }
 0x252   : > { %1536 = vpow2.f32 %v799_v0  ;;  %706 = vmax.xlane.f32.xlu2 %v705_v14  ;;  %709 = vmax.xlane.f32.xlu0 %v708_v17 }
 0x254   : > { %v1535_v54 = vpop.eup %1534 }
 0x255   : > { %v839_v34 = vpop.xlane.xlu1 %838  ;;  %v960_v2 = vmul.f32 %v1535_v54, %v2162_v42 }
 0x256   : > { %1538 = vrcp.f32 %v839_v34  ;;  %v456_v49 = vpop.f32.mrf.mxu1 }
 0x257   : > { %1396 = vmatmul.msk.f32.gmra.mxu2 %vm638_vm0, %v960_v2 }
 0x258   : > { %v2316_v37 = vpop.eup %1536 }
 0x259   : > { %v879_v8 = vsel %vm638_vm0, %v2316_v37, 0.0 }
 0x25a   : > { %880 = vadd.xlane.f32.xlu1 %v879_v8 }
 0x25c   : > { %v1539_v13 = vpop.eup %1538 }
 0x25d   : > { %v695_v4 = vpop.xlane.xlu1 %694  ;;  %v961_v42 = vmul.f32 %v1539_v13, %v2171_v23  ;;  %v692_v23 = vpop.xlane.xlu0 %691 }
 0x25e   : > { %v753_v27 = vsub.f32 %v2175_v33, %v695_v4  ;;  %v459_v62 = vpop.f32.mrf.mxu1  ;;  %v752_v36 = vsub.f32 %v2166_v43, %v692_v23 }
 0x25f   : > { %1397 = vmatmul.msk.f32.gmra.mxu2 %vm638_vm0, %v961_v42 }
 0x260   : > { %v803_v18 = vmul.f32 1.442695, %v753_v27  ;;  %v801_v60 = vmul.f32 1.442695, %v752_v36 }
 0x262   : > { %1540 = vpow2.f32 %v803_v18  ;;  %733 = vmax.xlane.f32.xlu1 %v732_v16 }
 0x265   : > { %v845_v33 = vpop.xlane.xlu0 %844 }
 0x266   : > { %v462_v26 = vpop.f32.mrf.mxu1 }
 0x268   : > { %v2328_v10 = vpop.eup %1540 }
 0x269   : > { %v885_v44 = vsel %vm638_vm0, %v2328_v10, 0.0 }
 0x26a   : > { %886 = vadd.xlane.f32.xlu1 %v885_v44 }
 0x26e   : > { %v465_v1 = vpop.f32.mrf.mxu1 }
 0x276   : > { %v468_v29 = vpop.f32.mrf.mxu1 }
 0x27e   : > { %v471_v46 = vpop.f32.mrf.mxu1 }
 0x27f   : > { %1218 = vmatpush.msrb.mxu3 %v471_v46 }
 0x281   : > { %1219 = vmatpush.msrb.mxu3 %v468_v29 }
 0x283   : > { %1220 = vmatpush.msrb.mxu3 %v465_v1 }
 0x285   : > { %v857_v45 = vpop.xlane.xlu0 %856  ;;  %1221 = vmatpush.msrb.mxu3 %v462_v26 }
 0x286   : > { %1542 = vrcp.f32 %v857_v45 }
 0x287   : > { %1222 = vmatpush.msrb.mxu3 %v459_v62 }
 0x289   : > { %1223 = vmatpush.msrb.mxu3 %v456_v49 }
 0x28b   : > { %1224 = vmatpush.msrb.mxu3 %v453_v6 }
 0x28c   : > { %v1543_v47 = vpop.eup %1542 }
 0x28d   : > { %v967_v51 = vmul.f32 %v1543_v47, %v2194_v12  ;;  %v842_v52 = vpop.xlane.xlu2 %841  ;;  %v713_v53 = vpop.xlane.xlu0 %712  ;;  %1225 = vmatpush.msrb.mxu3 %v2304_v9 }
 0x28e   : > { %1544 = vrcp.f32 %v842_v52  ;;  %v860_v57 = vpop.xlane.xlu1 %859  ;;  %v759_v7 = vsub.f32 %v2196_v30, %v713_v53 }
 0x28f   : > { %1546 = vrcp.f32 %v860_v57  ;;  %1403 = vmatmul.msk.f32.vlgmr.msra.gmra.mxu3 %vm638_vm0, %v967_v51 }
 0x290   : > { %v815_v28 = vmul.f32 1.442695, %v759_v7 }
 0x292   : > { %1548 = vpow2.f32 %v815_v28 }
 0x293   : > { %1550 = vrcp.f32 %v845_v33 }
 0x294   : > { %v1545_v63 = vpop.eup %1544  ;;  %1552 = vpow2.f32 %v801_v60 }
 0x295   : > { %v1547_v12 = vpop.eup %1546  ;;  %v698_v0 = vpop.xlane.xlu2 %697  ;;  %v962_v17 = vmul.f32 %v1545_v63, %v2208_v40 }
 0x296   : > { %v701_v14 = vpop.xlane.xlu0 %700  ;;  %v848_v54 = vpop.xlane.xlu1 %847  ;;  %v968_v30 = vmul.f32 %v1547_v12, %v2213_v21  ;;  %v754_v4 = vsub.f32 %v2202_v32, %v698_v0 }
 0x297   : > { %1398 = vmatmul.msk.f32.gmra.mxu2 %vm638_vm0, %v962_v17  ;;  %1554 = vrcp.f32 %v848_v54  ;;  %v755_v1 = vsub.f32 %v2221_v55, %v701_v14 }
 0x298   : > { %v2340_v43 = vpop.eup %1548  ;;  %1404 = vmatmul.msk.f32.gmra.mxu3 %vm638_vm0, %v968_v30 }
 0x299   : > { %v903_v34 = vsel %vm638_vm0, %v2340_v43, 0.0  ;;  %v1551_v2 = vpop.eup %1550 }
 0x29a   : > { %904 = vadd.xlane.f32.xlu2 %v903_v34  ;;  %v963_v8 = vmul.f32 %v1551_v2, %v2182_v56  ;;  %v2346_v21 = vpop.eup %1552  ;;  %v805_v56 = vmul.f32 1.442695, %v754_v4 }
 0x29b   : > { %v882_v27 = vsel %vm638_vm0, %v2346_v21, 0.0 }
 0x29d   : > { %v863_v6 = vpop.xlane.xlu2 %862  ;;  %v1555_v49 = vpop.eup %1554 }
 0x29e   : > { %v866_v40 = vpop.xlane.xlu0 %865  ;;  %1556 = vrcp.f32 %v863_v6  ;;  %v716_v9 = vpop.xlane.xlu1 %715  ;;  %v964_v44 = vmul.f32 %v1555_v49, %v2224_v20 }
 0x29f   : > { %v760_v13 = vsub.f32 %v2211_v19, %v716_v9  ;;  %1399 = vmatmul.msk.f32.gmra.mxu2 %vm638_vm0, %v963_v8 }
 0x2a1   : > { %v817_v42 = vmul.f32 1.442695, %v760_v13 }
 0x2a2   : > { %883 = vadd.xlane.f32.xlu2 %v882_v27 }
 0x2a3   : > { %1558 = vpow2.f32 %v817_v42 }
 0x2a4   : > { %v1557_v16 = vpop.eup %1556  ;;  %1560 = vrcp.f32 %v866_v40 }
 0x2a5   : > { %v719_v18 = vpop.xlane.xlu2 %718  ;;  %v969_v19 = vmul.f32 %v1557_v16, %v2236_v50  ;;  %1562 = vpow2.f32 %v805_v56 }
 0x2a6   : > { %v722_v62 = vpop.xlane.xlu0 %721  ;;  %v869_v26 = vpop.xlane.xlu1 %868  ;;  %v761_v23 = vsub.f32 %v2226_v31, %v719_v18  ;;  %v807_v31 = vmul.f32 1.442695, %v755_v1 }
 0x2a7   : > { %v762_v32 = vsub.f32 %v2245_v58, %v722_v62  ;;  %1400 = vmatmul.msk.f32.gmra.mxu2 %vm638_vm0, %v964_v44  ;;  %1405 = vmatmul.msk.f32.gmra.mxu3 %vm638_vm0, %v969_v19 }
 0x2a8   : > { %v819_v33 = vmul.f32 1.442695, %v761_v23 }
 0x2a9   : > { %v821_v29 = vmul.f32 1.442695, %v762_v32  ;;  %v2360_v45 = vpop.eup %1558 }
 0x2aa   : > { %v1561_v46 = vpop.eup %1560  ;;  %1564 = vpow2.f32 %v819_v33  ;;  %v906_v20 = vsel %vm638_vm0, %v2360_v45, 0.0 }
 0x2ab   : > { %1566 = vpow2.f32 %v821_v29  ;;  %907 = vadd.xlane.f32.xlu0 %v906_v20  ;;  %v970_v47 = vmul.f32 %v1561_v46, %v2240_v5  ;;  %v2365_v55 = vpop.eup %1562 }
 0x2ac   : > { %1568 = vrcp.f32 %v869_v26  ;;  %v888_v5 = vsel %vm638_vm0, %v2365_v55, 0.0 }
 0x2ad   : > { %v851_v50 = vpop.xlane.xlu2 %850 }
 0x2ae   : > { %v854_v58 = vpop.xlane.xlu0 %853  ;;  %v704_v51 = vpop.xlane.xlu1 %703  ;;  %1570 = vrcp.f32 %v851_v50 }
 0x2af   : > { %v756_v52 = vsub.f32 %v2267_v15, %v704_v51  ;;  %1406 = vmatmul.msk.f32.gmra.mxu3 %vm638_vm0, %v970_v47  ;;  %1572 = vpow2.f32 %v807_v31 }
 0x2b0   : > { %v2369_v53 = vpop.eup %1564 }
 0x2b1   : > { %v2371_v57 = vpop.eup %1566  ;;  %v809_v7 = vmul.f32 1.442695, %v756_v52  ;;  %v909_v36 = vsel %vm638_vm0, %v2369_v53, 0.0 }
 0x2b2   : > { %v1569_v28 = vpop.eup %1568  ;;  %910 = vadd.xlane.f32.xlu2 %v909_v36  ;;  %v912_v63 = vsel %vm638_vm0, %v2371_v57, 0.0 }
 0x2b3   : > { %1574 = vpow2.f32 %v809_v7  ;;  %889 = vadd.xlane.f32.xlu0 %v888_v5  ;;  %913 = vadd.xlane.f32.xlu1 %v912_v63  ;;  %v971_v14 = vmul.f32 %v1569_v28, %v2255_v61 }
 0x2b4   : > { %v1571_v15 = vpop.eup %1570  ;;  %1576 = vrcp.f32 %v854_v58 }
 0x2b5   : > { %v872_v60 = vpop.xlane.xlu2 %871  ;;  %v965_v0 = vmul.f32 %v1571_v15, %v2262_v39  ;;  %v2381_v17 = vpop.eup %1572 }
 0x2b6   : > { %v875_v12 = vpop.xlane.xlu0 %874  ;;  %1578 = vrcp.f32 %v872_v60  ;;  %v725_v54 = vpop.xlane.xlu1 %724  ;;  %v891_v6 = vsel %vm638_vm0, %v2381_v17, 0.0 }
 0x2b7   : > { %v763_v30 = vsub.f32 %v2258_v11, %v725_v54  ;;  %1401 = vmatmul.msk.f32.gmra.mxu2 %vm638_vm0, %v965_v0  ;;  %1407 = vmatmul.msk.f32.gmra.mxu3 %vm638_vm0, %v971_v14 }
 0x2b9   : > { %v2386_v34 = vpop.eup %1574  ;;  %v823_v2 = vmul.f32 1.442695, %v763_v30 }
 0x2ba   : > { %v1577_v40 = vpop.eup %1576  ;;  %892 = vadd.xlane.f32.xlu2 %v891_v6  ;;  %v894_v61 = vsel %vm638_vm0, %v2386_v34, 0.0 }
 0x2bb   : > { %1580 = vpow2.f32 %v823_v2  ;;  %895 = vadd.xlane.f32.xlu1 %v894_v61  ;;  %v966_v9 = vmul.f32 %v1577_v40, %v2264_v41 }
 0x2bc   : > { %v1579_v39 = vpop.eup %1578  ;;  %1582 = vrcp.f32 %v875_v12 }
 0x2bd   : > { %v728_v11 = vpop.xlane.xlu2 %727  ;;  %v972_v13 = vmul.f32 %v1579_v39, %v2277_v24 }
 0x2be   : > { %v731_v8 = vpop.xlane.xlu0 %730  ;;  %v764_v4 = vsub.f32 %v2275_v22, %v728_v11  ;;  %v878_v56 = vpop.xlane.xlu1 %877 }
 0x2bf   : > { %v765_v42 = vsub.f32 %v2290_v48, %v731_v8  ;;  %1402 = vmatmul.msk.f32.gmra.mxu2 %vm638_vm0, %v966_v9  ;;  %1408 = vmatmul.msk.f32.gmra.mxu3 %vm638_vm0, %v972_v13 }
 0x2c0   : > { %v825_v27 = vmul.f32 1.442695, %v764_v4 }
 0x2c1   : > { %v827_v49 = vmul.f32 1.442695, %v765_v42  ;;  %v2398_v16 = vpop.eup %1580 }
 0x2c2   : > { %v1583_v18 = vpop.eup %1582  ;;  %1584 = vpow2.f32 %v825_v27  ;;  %v915_v41 = vsel %vm638_vm0, %v2398_v16, 0.0 }
 0x2c3   : > { %1586 = vpow2.f32 %v827_v49  ;;  %916 = vadd.xlane.f32.xlu0 %v915_v41  ;;  %v973_v48 = vmul.f32 %v1583_v18, %v2280_v38 }
 0x2c4   : > { %1588 = vrcp.f32 %v878_v56 }
 0x2c5   : > { %v707_v22 = vpop.xlane.xlu2 %706 }
 0x2c6   : > { %v710_v24 = vpop.xlane.xlu0 %709  ;;  %v757_v62 = vsub.f32 %v2288_v3, %v707_v22 }
 0x2c7   : > { %v758_v44 = vsub.f32 %v2301_v59, %v710_v24  ;;  %1409 = vmatmul.msk.f32.gmra.mxu3 %vm638_vm0, %v973_v48 }
 0x2c8   : > { %v2406_v19 = vpop.eup %1584  ;;  %v811_v26 = vmul.f32 1.442695, %v757_v62 }
 0x2c9   : > { %v813_v23 = vmul.f32 1.442695, %v758_v44  ;;  %v2408_v32 = vpop.eup %1586  ;;  %v918_v1 = vsel %vm638_vm0, %v2406_v19, 0.0 }
 0x2ca   : > { %v1589_v33 = vpop.eup %1588  ;;  %1590 = vpow2.f32 %v811_v26  ;;  %919 = vadd.xlane.f32.xlu2 %v918_v1  ;;  %v921_v38 = vsel %vm638_vm0, %v2408_v32, 0.0 }
 0x2cb   : > { %1592 = vpow2.f32 %v813_v23  ;;  %922 = vadd.xlane.f32.xlu1 %v921_v38  ;;  %v974_v59 = vmul.f32 %v1589_v33, %v2296_v35 }
 0x2cd   : > { %v881_v3 = vpop.xlane.xlu1 %880 }
 0x2ce   : > { %1594 = vrcp.f32 %v881_v3 }
 0x2cf   : > { %1410 = vmatmul.msk.f32.gmra.mxu3 %vm638_vm0, %v974_v59 }
 0x2d0   : > { %v2416_v29 = vpop.eup %1590 }
 0x2d1   : > { %v2418_v46 = vpop.eup %1592  ;;  %v897_v20 = vsel %vm638_vm0, %v2416_v29, 0.0 }
 0x2d2   : > { %v1032_v31 = vpop.f32.mrf.mxu2  ;;  %898 = vadd.xlane.f32.xlu0 %v897_v20  ;;  %v900_v50 = vsel %vm638_vm0, %v2418_v46, 0.0 }
 0x2d3   : > { %1251 = vst [vmem:[%s2426_s15] sm:$0xff] %v1032_v31  ;;  %901 = vadd.xlane.f32.xlu2 %v900_v50 }
 0x2d4   : > { %v1595_v35 = vpop.eup %1594 }
 0x2d5   : > { %v975_v58 = vmul.f32 %v1595_v35, %v2316_v37  ;;  %v734_v47 = vpop.xlane.xlu1 %733 }
 0x2d6   : > { %v766_v51 = vsub.f32 %v2321_v25, %v734_v47 }
 0x2d7   : > { %1411 = vmatmul.msk.f32.vlgmr.msrb.gmra.mxu2 %vm638_vm0, %v975_v58 }
 0x2d8   : > { %v829_v52 = vmul.f32 1.442695, %v766_v51 }
 0x2da   : > { %1596 = vpow2.f32 %v829_v52  ;;  %v1035_v7 = vpop.f32.mrf.mxu2 }
 0x2db   : > { %1252 = vst [vmem:[%s2426_s15 + $0x8] sm:$0xff] %v1035_v7 }
 0x2dd   : > { %v887_v12 = vpop.xlane.xlu1 %886 }
 0x2e0   : > { %v2433_v36 = vpop.eup %1596 }
 0x2e1   : > { %v924_v28 = vsel %vm638_vm0, %v2433_v36, 0.0 }
 0x2e2   : > { %v1038_v5 = vpop.f32.mrf.mxu2  ;;  %925 = vadd.xlane.f32.xlu0 %v924_v28 }
 0x2e3   : > { %1253 = vst [vmem:[%s2426_s15 + $0x10] sm:$0xff] %v1038_v5 }
 0x30d   : > { %v905_v37 = vpop.xlane.xlu2 %904 }
 0x30e   : > { %1598 = vrcp.f32 %v905_v37 }
 0x312   : > { %v1097_v63 = vpop.f32.mrf.mxu3 }
 0x313   : > { %1259 = vst [vmem:[%s2426_s15 + $0x40] sm:$0xff] %v1097_v63 }
 0x314   : > { %v1599_v25 = vpop.eup %1598 }
 0x315   : > { %v983_v15 = vmul.f32 %v1599_v25, %v2340_v43  ;;  %v884_v60 = vpop.xlane.xlu2 %883 }
 0x316   : > { %1600 = vrcp.f32 %v884_v60 }
 0x317   : > { %1419 = vmatmul.msk.f32.vlgmr.msrb.gmra.mxu3 %vm638_vm0, %v983_v15  ;;  %1602 = vrcp.f32 %v887_v12 }
 0x31a   : > { %v1041_v0 = vpop.f32.mrf.mxu2 }
 0x31b   : > { %1254 = vst [vmem:[%s2426_s15 + $0x18] sm:$0xff] %v1041_v0  ;;  %v1100_v14 = vpop.f32.mrf.mxu3 }
 0x31c   : > { %v1601_v54 = vpop.eup %1600  ;;  %1260 = vst [vmem:[%s2426_s15 + $0x48] sm:$0xff] %v1100_v14 }
 0x31d   : > { %v976_v30 = vmul.f32 %v1601_v54, %v2346_v21  ;;  %v1603_v43 = vpop.eup %1602 }
 0x31e   : > { %v908_v2 = vpop.xlane.xlu0 %907  ;;  %v977_v39 = vmul.f32 %v1603_v43, %v2328_v10 }
 0x31f   : > { %1604 = vrcp.f32 %v908_v2  ;;  %1412 = vmatmul.msk.f32.gmra.mxu2 %vm638_vm0, %v976_v30 }
 0x322   : > { %v1044_v6 = vpop.f32.mrf.mxu2 }
 0x323   : > { %1255 = vst [vmem:[%s2426_s15 + $0x20] sm:$0xff] %v1044_v6 }
 0x325   : > { %v1605_v40 = vpop.eup %1604  ;;  %v911_v61 = vpop.xlane.xlu2 %910 }
 0x326   : > { %1606 = vrcp.f32 %v911_v61  ;;  %v890_v11 = vpop.xlane.xlu0 %889  ;;  %v984_v8 = vmul.f32 %v1605_v40, %v2360_v45  ;;  %v914_v21 = vpop.xlane.xlu1 %913 }
 0x327   : > { %1608 = vrcp.f32 %v890_v11  ;;  %1413 = vmatmul.msk.f32.gmra.mxu2 %vm638_vm0, %v977_v39 }
 0x328   : > { %1420 = vmatmul.msk.f32.gmra.mxu3 %vm638_vm0, %v984_v8  ;;  %1610 = vrcp.f32 %v914_v21 }
 0x32a   : > { %v1047_v9 = vpop.f32.mrf.mxu2  ;;  %v1103_v13 = vpop.f32.mrf.mxu3 }
 0x32b   : > { %1256 = vst [vmem:[%s2426_s15 + $0x28] sm:$0xff] %v1047_v9 }
 0x32c   : > { %v1607_v4 = vpop.eup %1606  ;;  %1261 = vst [vmem:[%s2426_s15 + $0x50] sm:$0xff] %v1103_v13 }
 0x32d   : > { %v1609_v42 = vpop.eup %1608  ;;  %v893_v27 = vpop.xlane.xlu2 %892  ;;  %v985_v10 = vmul.f32 %v1607_v4, %v2369_v53 }
 0x32e   : > { %1612 = vrcp.f32 %v893_v27  ;;  %v978_v45 = vmul.f32 %v1609_v42, %v2365_v55  ;;  %v896_v49 = vpop.xlane.xlu1 %895  ;;  %v1611_v18 = vpop.eup %1610 }
 0x32f   : > { %1614 = vrcp.f32 %v896_v49  ;;  %v986_v53 = vmul.f32 %v1611_v18, %v2371_v57 }
 0x330   : > { %1414 = vmatmul.msk.f32.gmra.mxu2 %vm638_vm0, %v978_v45  ;;  %1421 = vmatmul.msk.f32.gmra.mxu3 %vm638_vm0, %v985_v10 }
 0x332   : > { %v1106_v56 = vpop.f32.mrf.mxu3 }
 0x333   : > { %1262 = vst [vmem:[%s2426_s15 + $0x58] sm:$0xff] %v1106_v56 }
 0x334   : > { %v1613_v41 = vpop.eup %1612 }
 0x335   : > { %v979_v22 = vmul.f32 %v1613_v41, %v2381_v17  ;;  %v1615_v62 = vpop.eup %1614 }
 0x336   : > { %v917_v24 = vpop.xlane.xlu0 %916  ;;  %v980_v17 = vmul.f32 %v1615_v62, %v2386_v34 }
 0x337   : > { %1616 = vrcp.f32 %v917_v24 }
 0x338   : > { %1415 = vmatmul.msk.f32.gmra.mxu2 %vm638_vm0, %v979_v22  ;;  %1422 = vmatmul.msk.f32.gmra.mxu3 %vm638_vm0, %v986_v53 }
 0x33a   : > { %v1050_v55 = vpop.f32.mrf.mxu2  ;;  %v1109_v48 = vpop.f32.mrf.mxu3 }
 0x33b   : > { %1257 = vst [vmem:[%s2426_s15 + $0x30] sm:$0xff] %v1050_v55 }
 0x33c   : > { %1263 = vst [vmem:[%s2426_s15 + $0x60] sm:$0xff] %v1109_v48 }
 0x33d   : > { %v1617_v44 = vpop.eup %1616  ;;  %v920_v26 = vpop.xlane.xlu2 %919 }
 0x33e   : > { %1618 = vrcp.f32 %v920_v26  ;;  %v987_v23 = vmul.f32 %v1617_v44, %v2398_v16  ;;  %v923_v57 = vpop.xlane.xlu1 %922 }
 0x33f   : > { %1620 = vrcp.f32 %v923_v57 }
 0x340   : > { %1416 = vmatmul.msk.f32.gmra.mxu2 %vm638_vm0, %v980_v17  ;;  %1423 = vmatmul.msk.f32.gmra.mxu3 %vm638_vm0, %v987_v23 }
 0x342   : > { %v1053_v1 = vpop.f32.mrf.mxu2  ;;  %v1112_v33 = vpop.f32.mrf.mxu3 }
 0x343   : > { %1258 = vst [vmem:[%s2426_s15 + $0x38] sm:$0xff] %v1053_v1 }
 0x344   : > { %v1619_v38 = vpop.eup %1618  ;;  %1264 = vst [vmem:[%s2426_s15 + $0x68] sm:$0xff] %v1112_v33 }
 0x345   : > { %v899_v3 = vpop.xlane.xlu0 %898  ;;  %v988_v59 = vmul.f32 %v1619_v38, %v2406_v19  ;;  %v1621_v20 = vpop.eup %1620 }
 0x346   : > { %1622 = vrcp.f32 %v899_v3  ;;  %v902_v34 = vpop.xlane.xlu2 %901  ;;  %v989_v35 = vmul.f32 %v1621_v20, %v2408_v32 }
 0x347   : > { %1624 = vrcp.f32 %v902_v34 }
 0x348   : > { %1424 = vmatmul.msk.f32.gmra.mxu3 %vm638_vm0, %v988_v59 }
 0x34a   : > { %v1115_v16 = vpop.f32.mrf.mxu3 }
 0x34b   : > { %1265 = vst [vmem:[%s2426_s15 + $0x70] sm:$0xff] %v1115_v16 }
 0x34c   : > { %v1623_v31 = vpop.eup %1622 }
 0x34d   : > { %v981_v50 = vmul.f32 %v1623_v31, %v2416_v29  ;;  %v1625_v19 = vpop.eup %1624 }
 0x34e   : > { %v982_v47 = vmul.f32 %v1625_v19, %v2418_v46 }
 0x34f   : > { %1417 = vmatmul.msk.f32.gmra.mxu2 %vm638_vm0, %v981_v50 }
 0x350   : > { %1425 = vmatmul.msk.f32.gmra.mxu3 %vm638_vm0, %v989_v35 }
 0x352   : > { %v1118_v58 = vpop.f32.mrf.mxu3 }
 0x353   : > { %1266 = vst [vmem:[%s2426_s15 + $0x78] sm:$0xff] %v1118_v58 }
 0x355   : > { %v926_v51 = vpop.xlane.xlu0 %925 }
 0x356   : > { %1626 = vrcp.f32 %v926_v51 }
 0x357   : > { %1418 = vmatmul.msk.f32.gmra.mxu2 %vm638_vm0, %v982_v47 }
 0x35a   : > { %v1162_v29 = vpop.f32.mrf.mxu2 }
 0x35b   : > { %1267 = vst [vmem:[%s2426_s15 + $0x80] sm:$0xff] %v1162_v29 }
 0x35c   : > { %v1627_v32 = vpop.eup %1626 }
 0x35d   : > { %v990_v52 = vmul.f32 %v1627_v32, %v2433_v36 }
 0x35f   : > { %1426 = vmatmul.msk.f32.gmra.mxu3 %vm638_vm0, %v990_v52 }
 0x39a   : > { %v1227_v7 = vpop.f32.mrf.mxu3 }
 0x39b   : > { %1275 = vst [vmem:[%s2426_s15 + $0xc0] sm:$0xff] %v1227_v7 }
 0x3a2   : > { %v1165_v28 = vpop.f32.mrf.mxu2 }
 0x3a3   : > { %1268 = vst [vmem:[%s2426_s15 + $0x88] sm:$0xff] %v1165_v28 }
 0x3aa   : > { %v1168_v46 = vpop.f32.mrf.mxu2 }
 0x3ab   : > { %1269 = vst [vmem:[%s2426_s15 + $0x90] sm:$0xff] %v1168_v46  ;;  %v1230_v5 = vpop.f32.mrf.mxu3 }
 0x3ac   : > { %1276 = vst [vmem:[%s2426_s15 + $0xc8] sm:$0xff] %v1230_v5 }
 0x3b3   : > { %v1171_v37 = vpop.f32.mrf.mxu2  ;;  %v1233_v63 = vpop.f32.mrf.mxu3 }
 0x3b4   : > { %1270 = vst [vmem:[%s2426_s15 + $0x98] sm:$0xff] %v1171_v37 }
 0x3b5   : > { %1277 = vst [vmem:[%s2426_s15 + $0xd0] sm:$0xff] %v1233_v63 }
 0x3bb   : > { %v1174_v36 = vpop.f32.mrf.mxu2  ;;  %v1236_v25 = vpop.f32.mrf.mxu3 }
 0x3bc   : > { %1271 = vst [vmem:[%s2426_s15 + $0xa0] sm:$0xff] %v1174_v36 }
 0x3bd   : > { %1278 = vst [vmem:[%s2426_s15 + $0xd8] sm:$0xff] %v1236_v25 }
 0x3c3   : > { %v1177_v15 = vpop.f32.mrf.mxu2  ;;  %v1239_v60 = vpop.f32.mrf.mxu3 }
 0x3c4   : > { %1272 = vst [vmem:[%s2426_s15 + $0xa8] sm:$0xff] %v1177_v15 }
 0x3c5   : > { %1279 = vst [vmem:[%s2426_s15 + $0xe0] sm:$0xff] %v1239_v60 }
 0x3cb   : > { %v1242_v12 = vpop.f32.mrf.mxu3 }
 0x3cc   : > { %1280 = vst [vmem:[%s2426_s15 + $0xe8] sm:$0xff] %v1242_v12 }
 0x3d2   : > { %v1180_v0 = vpop.f32.mrf.mxu2 }
 0x3d3   : > { %1273 = vst [vmem:[%s2426_s15 + $0xb0] sm:$0xff] %v1180_v0  ;;  %v1245_v14 = vpop.f32.mrf.mxu3 }
 0x3d4   : > { %1281 = vst [vmem:[%s2426_s15 + $0xf0] sm:$0xff] %v1245_v14 }
 0x3da   : > { %v1183_v54 = vpop.f32.mrf.mxu2 }
 0x3db   : > { %1274 = vst [vmem:[%s2426_s15 + $0xb8] sm:$0xff] %v1183_v54 }
 0x3e2   : > { %v1248_v30 = vpop.f32.mrf.mxu3 }
 0x3e3   : > { %1282 = vst [vmem:[%s2426_s15 + $0xf8] sm:$0xff] %v1248_v30 }
 0x3e4   : > { %1715 = shalt.err (!%p1712_p10)
}
 0x3e5   : > { %s1765_s4 = smov 128   ;;  %s1766_s5 = smov 8  }
 0x3e6   : > { %1443 = dma.vmem_to_hbm [thread:$0]  (%p1849_p7), %s1298_s19, 4096, %s1300_s21, %s1284_s22, %s1765_s4, %s1765_s4, %s1766_s5  }
 0x3e7 PF: > { %s1314_s6 = sand.u32 1, %s1746_s9   ;;  %p2539_p12 = scmp.ge.s32.totalorder %s1758_s12, 2 }
 0x3e8   : > { %s1315_s7 = scalar_lea.sflag [#allocation4], %s1314_s6 }
 0x3e9   : > { %p1454_p13 = pnand %p2539_p12, %p1817_p6 }
 0x3eb   : > { %p1455_p0 = pneg %p1454_p13 }
 0x3ed   : > { %1741 = dma.done.wait (%p1455_p0), %s1315_s7, 4096  }
 0x3ee   : > { %1743 = vsyncadd (%p1455_p0), %s1315_s7, 4294963200  ;;  %p16_p3 = scmp.ge.s32.totalorder %s1835_s23, 4   ;;  %s2540_s9 = smov %s1750_s10 }
 0x3ef   : > { %s2541_s10 = smov %s1754_s11  ;;  %s2542_s11 = smov %s1845_s28 }
 0x3f0   : > { %s2543_s12 = smov %s1835_s23  ;;  %18 = sbr.rel (!%p16_p3) target bundleno = 6 (0x6), region = 77 }
 0x3f5   :  { %1321 = vsyncpa [#allocation3], 1 }
 0x3f6   :  { %1323 = vsyncpa [#allocation3 + $0x1], 1 }
 0x3f7   :  { %1324 = vsyncpa [#allocation6], 1 }
 0x3f8   :  { %1325 = vsyncpa [#allocation4], 1 }
 0x3f9   :  { %1327 = vsyncpa [#allocation4 + $0x1], 1 }

</bundles_post_ra>
